<compile_context>
chip_gen: v6e
topology: v6e:2x2x1
jax: 0.10.0
libtpu: 0.0.40
codegen_flags: <defaults>
</compile_context>

<pallas_src>
import jax
import jax.numpy as jnp
import numpy as np
from jax import lax
from jax.experimental import pallas as pl
from jax.experimental.pallas import tpu as pltpu

BN_EPS = 1e-5


# ---------------------------------------------------------------------------
# Fused kernel: conv3x3 ('same' zero pad) + train-mode BatchNorm + ReLU.
# ---------------------------------------------------------------------------
def make_fused_kernel(N, Cin, Cout, H, W):
    HW = H * W

    def kernel(x_ref, w_ref, gamma_ref, beta_ref, out_ref):
        """Whole batch resident in VMEM.

        x_ref     : (N, Cin, H*W)      VMEM f32  input images (H*W on lanes)
        w_ref     : (9*Cin, Cout, 1)   VMEM f32  taps; row = (ky*3+kx)*Cin + ci
        gamma_ref : (Cout, 1)          VMEM f32  BN gamma
        beta_ref  : (Cout, 1)          VMEM f32  BN beta
        out_ref   : (N, Cout, H*W)     VMEM f32  normalized + ReLU output
        """
        x = x_ref[...]                                            # (N, Cin, HW)

        # ---- padding masks: built ONCE from a single lane iota, reused 8x ----
        pos = lax.broadcasted_iota(jnp.int32, (1, 1, HW), 2)
        col = pos % W                          # W is a power of two -> cheap AND
        left_ok = col >= 1                     # tap reads w-1
        right_ok = col <= W - 2                # tap reads w+1
        up_ok = pos >= W                       # tap reads h-1
        down_ok = pos < (H - 1) * W            # tap reads h+1

        def tap_input(dy, dx):
            """x[n, c, h+dy, w+dx] with zero 'same' padding, flattened layout."""
            off = dy * W + dx
            y = x if off == 0 else pltpu.roll(x, shift=(-off) % HW, axis=2)
            m = None
            if dy == -1:
                m = up_ok
            elif dy == 1:
                m = down_ok
            if dx == -1:
                m = left_ok if m is None else (m & left_ok)
            elif dx == 1:
                m = right_ok if m is None else (m & right_ok)
            if m is not None:
                y = jnp.where(m, y, 0.0)
            return y                                              # (N, Cin, HW)

        # ---- 3x3 conv: 9 taps x Cin broadcast-FMAs onto dense (Cout, HW) accs.
        # Conv bias omitted: exactly cancelled by BN mean subtraction below.
        accs = [jnp.zeros((Cout, HW), jnp.float32) for _ in range(N)]
        for k in range(9):
            dy, dx = k // 3 - 1, k % 3 - 1
            xs = tap_input(dy, dx)                                # (N, Cin, HW)
            for ci in range(Cin):
                w_col = w_ref[k * Cin + ci]                       # (Cout, 1)
                for n in range(N):
                    plane = xs[n, ci][None, :]                    # (1, HW)
                    accs[n] = accs[n] + w_col * plane             # (Cout, HW)

        # ---- train-mode BatchNorm stats over (N, H, W), two-pass variance ----
        inv_cnt = jnp.float32(1.0 / (N * HW))
        total = accs[0]
        for n in range(1, N):
            total = total + accs[n]
        mean = jnp.sum(total, axis=1, keepdims=True) * inv_cnt    # (Cout, 1)

        var = jnp.zeros((Cout, 1), jnp.float32)
        for n in range(N):
            d = accs[n] - mean
            var = var + jnp.sum(d * d, axis=1, keepdims=True)
        var = var * inv_cnt                                       # biased var

        scale = gamma_ref[...] * lax.rsqrt(var + BN_EPS)          # (Cout, 1)
        shift = beta_ref[...] - mean * scale                      # (Cout, 1)

        # ---- normalize + ReLU: lane-dense (Cout, HW) stores -------------------
        for n in range(N):
            out_ref[n] = jnp.maximum(accs[n] * scale + shift, 0.0)

    return kernel


# ---------------------------------------------------------------------------
# Wrapper
# ---------------------------------------------------------------------------
@jax.jit
def single_conv(x_nchw, conv_w, conv_b, bn_gamma, bn_beta):
    """Forward of SingleConv.  x_nchw: (N, Cin, H, W) -> (N, Cout, H, W)."""
    del conv_b  # exactly cancelled by train-mode BatchNorm mean subtraction
    N, Cin, H, W = x_nchw.shape
    Cout = conv_w.shape[0]
    HW = H * W

    # Free metadata reshapes (contiguous NCHW): H*W onto the lane axis.
    x_flat = x_nchw.astype(jnp.float32).reshape(N, Cin, HW)
    # OIHW -> (ky, kx, ci, co) -> (9*Cin, Cout, 1); row index = (ky*3+kx)*Cin + ci.
    w_lay = conv_w.astype(jnp.float32).transpose(2, 3, 1, 0).reshape(9 * Cin, Cout, 1)
    gamma = bn_gamma.astype(jnp.float32).reshape(Cout, 1)
    beta = bn_beta.astype(jnp.float32).reshape(Cout, 1)

    vmem = pl.BlockSpec(memory_space=pltpu.MemorySpace.VMEM)
    out_flat = pl.pallas_call(
        make_fused_kernel(N, Cin, Cout, H, W),
        out_shape=jax.ShapeDtypeStruct((N, Cout, HW), jnp.float32),
        in_specs=[vmem, vmem, vmem, vmem],
        out_specs=vmem,
    )(x_flat, w_lay, gamma, beta)

    return out_flat.reshape(N, Cout, H, W)


# ---------------------------------------------------------------------------
# Pure-JAX reference (same semantics as the PyTorch module in train mode).
# ---------------------------------------------------------------------------
def single_conv_ref(x_nchw, w_oihw, b, gamma, beta):
    conv = lax.conv_general_dilated(
        x_nchw.astype(jnp.float32), w_oihw.astype(jnp.float32),
        window_strides=(1, 1), padding=((1, 1), (1, 1)),
        dimension_numbers=("NCHW", "OIHW", "NCHW"))
    conv = conv + b.reshape(1, -1, 1, 1)
    mean = jnp.mean(conv, axis=(0, 2, 3), keepdims=True)
    var = jnp.mean((conv - mean) ** 2, axis=(0, 2, 3), keepdims=True)
    y = (conv - mean) * lax.rsqrt(var + BN_EPS)
    y = y * gamma.reshape(1, -1, 1, 1) + beta.reshape(1, -1, 1, 1)
    return jnp.maximum(y, 0.0)


if __name__ == "__main__":
    # SingleConv(in_ch=4, out_ch=8), input (N=2, C=4, H=16, W=16)
    in_ch, out_ch = 4, 8
    N, H, W = 2, 16, 16

    key = jax.random.PRNGKey(0)
    kx, kw, kb, kg, kbe = jax.random.split(key, 5)

    x = jax.random.normal(kx, (N, in_ch, H, W), dtype=jnp.float32)
    fan_in = in_ch * 3 * 3
    bound = 1.0 / np.sqrt(fan_in)
    conv_w = jax.random.uniform(kw, (out_ch, in_ch, 3, 3), jnp.float32, -bound, bound)
    conv_b = jax.random.uniform(kb, (out_ch,), jnp.float32, -bound, bound)
    bn_gamma = 1.0 + 0.1 * jax.random.normal(kg, (out_ch,), dtype=jnp.float32)
    bn_beta = 0.1 * jax.random.normal(kbe, (out_ch,), dtype=jnp.float32)

    out = single_conv(x, conv_w, conv_b, bn_gamma, bn_beta)
    out = jax.block_until_ready(out)

    ref = single_conv_ref(x, conv_w, conv_b, bn_gamma, bn_beta)
    np.testing.assert_allclose(np.asarray(out), np.asarray(ref), rtol=5e-4, atol=5e-4)

    print("KERNEL_OK")
</pallas_src>

<mosaic_0001>
module attributes {stable_mosaic.version = 11 : i64} {
  func.func @kernel(%arg0: memref<2x4x256xf32, #tpu.memory_space<vmem>>, %arg1: memref<36x8x1xf32, #tpu.memory_space<vmem>>, %arg2: memref<8x1xf32, #tpu.memory_space<vmem>>, %arg3: memref<8x1xf32, #tpu.memory_space<vmem>>, %arg4: memref<2x8x256xf32, #tpu.memory_space<vmem>>) attributes {dimension_semantics = [], scalar_prefetch = 0 : i64, scratch_operands = 0 : i64, tpu.core_type = #tpu.core_type<tc>} {
    %c0 = arith.constant 0 : index
    %c0_0 = arith.constant 0 : index
    %c0_1 = arith.constant 0 : index
    %0 = vector.load %arg0[%c0, %c0_0, %c0_1] : memref<2x4x256xf32, #tpu.memory_space<vmem>>, vector<2x4x256xf32>
    %1 = tpu.iota {dimensions = array<i32: 2>} : vector<1x1x256xi32>
    %c16_i32 = arith.constant 16 : i32
    %c0_i32 = arith.constant 0 : i32
    %2 = arith.cmpi eq, %c16_i32, %c0_i32 : i32
    %c1_i32 = arith.constant 1 : i32
    %3 = arith.select %2, %c1_i32, %c16_i32 : i32
    %4 = vector.broadcast %3 : i32 to vector<1x1x256xi32>
    %5 = arith.remsi %1, %4 : vector<1x1x256xi32>
    %c0_i32_2 = arith.constant 0 : i32
    %6 = vector.broadcast %c0_i32_2 : i32 to vector<1x1x256xi32>
    %7 = arith.cmpi ne, %5, %6 : vector<1x1x256xi32>
    %c0_i32_3 = arith.constant 0 : i32
    %8 = vector.broadcast %c0_i32_3 : i32 to vector<1x1x256xi32>
    %9 = arith.cmpi slt, %5, %8 : vector<1x1x256xi32>
    %c0_i32_4 = arith.constant 0 : i32
    %10 = arith.cmpi slt, %3, %c0_i32_4 : i32
    %11 = vector.broadcast %10 : i1 to vector<1x1x256xi1>
    %12 = vector.broadcast %11 : vector<1x1x256xi1> to vector<1x1x256xi1>
    %13 = arith.xori %9, %12 : vector<1x1x256xi1>
    %14 = arith.andi %13, %7 : vector<1x1x256xi1>
    %15 = vector.broadcast %3 : i32 to vector<1x1x256xi32>
    %16 = arith.addi %5, %15 : vector<1x1x256xi32>
    %17 = arith.select %14, %16, %5 : vector<1x1x256xi1>, vector<1x1x256xi32>
    %c1_i32_5 = arith.constant 1 : i32
    %18 = vector.broadcast %c1_i32_5 : i32 to vector<1x1x256xi32>
    %19 = arith.cmpi sge, %17, %18 : vector<1x1x256xi32>
    %c14_i32 = arith.constant 14 : i32
    %20 = vector.broadcast %c14_i32 : i32 to vector<1x1x256xi32>
    %21 = arith.cmpi sle, %17, %20 : vector<1x1x256xi32>
    %c16_i32_6 = arith.constant 16 : i32
    %22 = vector.broadcast %c16_i32_6 : i32 to vector<1x1x256xi32>
    %23 = arith.cmpi sge, %1, %22 : vector<1x1x256xi32>
    %c240_i32 = arith.constant 240 : i32
    %24 = vector.broadcast %c240_i32 : i32 to vector<1x1x256xi32>
    %25 = arith.cmpi slt, %1, %24 : vector<1x1x256xi32>
    %cst = arith.constant 0.000000e+00 : f32
    %26 = vector.broadcast %cst : f32 to vector<8x256xf32>
    %cst_7 = arith.constant 0.000000e+00 : f32
    %27 = vector.broadcast %cst_7 : f32 to vector<8x256xf32>
    %c17_i32 = arith.constant 17 : i32
    %28 = tpu.dynamic_rotate %0 by %c17_i32 dim 2 : vector<2x4x256xf32>, i32 -> vector<2x4x256xf32>
    %29 = arith.andi %23, %19 : vector<1x1x256xi1>
    %cst_8 = arith.constant 0.000000e+00 : f32
    %30 = vector.shape_cast %29 : vector<1x1x256xi1> to vector<1x1x256xi1>
    %31 = vector.broadcast %30 : vector<1x1x256xi1> to vector<2x4x256xi1>
    %32 = vector.broadcast %cst_8 : f32 to vector<2x4x256xf32>
    %33 = arith.select %31, %28, %32 : vector<2x4x256xi1>, vector<2x4x256xf32>
    %c0_9 = arith.constant 0 : index
    %c0_10 = arith.constant 0 : index
    %c0_11 = arith.constant 0 : index
    %34 = vector.load %arg1[%c0_9, %c0_10, %c0_11] : memref<36x8x1xf32, #tpu.memory_space<vmem>>, vector<1x8x1xf32>
    %35 = vector.shape_cast %34 : vector<1x8x1xf32> to vector<8x1xf32>
    %36 = vector.extract_strided_slice %33 {offsets = [0, 0, 0], sizes = [1, 1, 256], strides = [1, 1, 1]} : vector<2x4x256xf32> to vector<1x1x256xf32>
    %37 = vector.shape_cast %36 : vector<1x1x256xf32> to vector<256xf32>
    %38 = vector.shape_cast %37 : vector<256xf32> to vector<1x256xf32>
    %39 = vector.broadcast %35 : vector<8x1xf32> to vector<8x256xf32>
    %40 = vector.broadcast %38 : vector<1x256xf32> to vector<8x256xf32>
    %41 = arith.mulf %39, %40 : vector<8x256xf32>
    %42 = arith.addf %26, %41 : vector<8x256xf32>
    %43 = vector.extract_strided_slice %33 {offsets = [1, 0, 0], sizes = [1, 1, 256], strides = [1, 1, 1]} : vector<2x4x256xf32> to vector<1x1x256xf32>
    %44 = vector.shape_cast %43 : vector<1x1x256xf32> to vector<256xf32>
    %45 = vector.shape_cast %44 : vector<256xf32> to vector<1x256xf32>
    %46 = vector.broadcast %35 : vector<8x1xf32> to vector<8x256xf32>
    %47 = vector.broadcast %45 : vector<1x256xf32> to vector<8x256xf32>
    %48 = arith.mulf %46, %47 : vector<8x256xf32>
    %49 = arith.addf %27, %48 : vector<8x256xf32>
    %c1 = arith.constant 1 : index
    %c0_12 = arith.constant 0 : index
    %c0_13 = arith.constant 0 : index
    %50 = vector.load %arg1[%c1, %c0_12, %c0_13] : memref<36x8x1xf32, #tpu.memory_space<vmem>>, vector<1x8x1xf32>
    %51 = vector.shape_cast %50 : vector<1x8x1xf32> to vector<8x1xf32>
    %52 = vector.extract_strided_slice %33 {offsets = [0, 1, 0], sizes = [1, 1, 256], strides = [1, 1, 1]} : vector<2x4x256xf32> to vector<1x1x256xf32>
    %53 = vector.shape_cast %52 : vector<1x1x256xf32> to vector<256xf32>
    %54 = vector.shape_cast %53 : vector<256xf32> to vector<1x256xf32>
    %55 = vector.broadcast %51 : vector<8x1xf32> to vector<8x256xf32>
    %56 = vector.broadcast %54 : vector<1x256xf32> to vector<8x256xf32>
    %57 = arith.mulf %55, %56 : vector<8x256xf32>
    %58 = arith.addf %42, %57 : vector<8x256xf32>
    %59 = vector.extract_strided_slice %33 {offsets = [1, 1, 0], sizes = [1, 1, 256], strides = [1, 1, 1]} : vector<2x4x256xf32> to vector<1x1x256xf32>
    %60 = vector.shape_cast %59 : vector<1x1x256xf32> to vector<256xf32>
    %61 = vector.shape_cast %60 : vector<256xf32> to vector<1x256xf32>
    %62 = vector.broadcast %51 : vector<8x1xf32> to vector<8x256xf32>
    %63 = vector.broadcast %61 : vector<1x256xf32> to vector<8x256xf32>
    %64 = arith.mulf %62, %63 : vector<8x256xf32>
    %65 = arith.addf %49, %64 : vector<8x256xf32>
    %c2 = arith.constant 2 : index
    %c0_14 = arith.constant 0 : index
    %c0_15 = arith.constant 0 : index
    %66 = vector.load %arg1[%c2, %c0_14, %c0_15] : memref<36x8x1xf32, #tpu.memory_space<vmem>>, vector<1x8x1xf32>
    %67 = vector.shape_cast %66 : vector<1x8x1xf32> to vector<8x1xf32>
    %68 = vector.extract_strided_slice %33 {offsets = [0, 2, 0], sizes = [1, 1, 256], strides = [1, 1, 1]} : vector<2x4x256xf32> to vector<1x1x256xf32>
    %69 = vector.shape_cast %68 : vector<1x1x256xf32> to vector<256xf32>
    %70 = vector.shape_cast %69 : vector<256xf32> to vector<1x256xf32>
    %71 = vector.broadcast %67 : vector<8x1xf32> to vector<8x256xf32>
    %72 = vector.broadcast %70 : vector<1x256xf32> to vector<8x256xf32>
    %73 = arith.mulf %71, %72 : vector<8x256xf32>
    %74 = arith.addf %58, %73 : vector<8x256xf32>
    %75 = vector.extract_strided_slice %33 {offsets = [1, 2, 0], sizes = [1, 1, 256], strides = [1, 1, 1]} : vector<2x4x256xf32> to vector<1x1x256xf32>
    %76 = vector.shape_cast %75 : vector<1x1x256xf32> to vector<256xf32>
    %77 = vector.shape_cast %76 : vector<256xf32> to vector<1x256xf32>
    %78 = vector.broadcast %67 : vector<8x1xf32> to vector<8x256xf32>
    %79 = vector.broadcast %77 : vector<1x256xf32> to vector<8x256xf32>
    %80 = arith.mulf %78, %79 : vector<8x256xf32>
    %81 = arith.addf %65, %80 : vector<8x256xf32>
    %c3 = arith.constant 3 : index
    %c0_16 = arith.constant 0 : index
    %c0_17 = arith.constant 0 : index
    %82 = vector.load %arg1[%c3, %c0_16, %c0_17] : memref<36x8x1xf32, #tpu.memory_space<vmem>>, vector<1x8x1xf32>
    %83 = vector.shape_cast %82 : vector<1x8x1xf32> to vector<8x1xf32>
    %84 = vector.extract_strided_slice %33 {offsets = [0, 3, 0], sizes = [1, 1, 256], strides = [1, 1, 1]} : vector<2x4x256xf32> to vector<1x1x256xf32>
    %85 = vector.shape_cast %84 : vector<1x1x256xf32> to vector<256xf32>
    %86 = vector.shape_cast %85 : vector<256xf32> to vector<1x256xf32>
    %87 = vector.broadcast %83 : vector<8x1xf32> to vector<8x256xf32>
    %88 = vector.broadcast %86 : vector<1x256xf32> to vector<8x256xf32>
    %89 = arith.mulf %87, %88 : vector<8x256xf32>
    %90 = arith.addf %74, %89 : vector<8x256xf32>
    %91 = vector.extract_strided_slice %33 {offsets = [1, 3, 0], sizes = [1, 1, 256], strides = [1, 1, 1]} : vector<2x4x256xf32> to vector<1x1x256xf32>
    %92 = vector.shape_cast %91 : vector<1x1x256xf32> to vector<256xf32>
    %93 = vector.shape_cast %92 : vector<256xf32> to vector<1x256xf32>
    %94 = vector.broadcast %83 : vector<8x1xf32> to vector<8x256xf32>
    %95 = vector.broadcast %93 : vector<1x256xf32> to vector<8x256xf32>
    %96 = arith.mulf %94, %95 : vector<8x256xf32>
    %97 = arith.addf %81, %96 : vector<8x256xf32>
    %c16_i32_18 = arith.constant 16 : i32
    %98 = tpu.dynamic_rotate %0 by %c16_i32_18 dim 2 : vector<2x4x256xf32>, i32 -> vector<2x4x256xf32>
    %cst_19 = arith.constant 0.000000e+00 : f32
    %99 = vector.shape_cast %23 : vector<1x1x256xi1> to vector<1x1x256xi1>
    %100 = vector.broadcast %99 : vector<1x1x256xi1> to vector<2x4x256xi1>
    %101 = vector.broadcast %cst_19 : f32 to vector<2x4x256xf32>
    %102 = arith.select %100, %98, %101 : vector<2x4x256xi1>, vector<2x4x256xf32>
    %c4 = arith.constant 4 : index
    %c0_20 = arith.constant 0 : index
    %c0_21 = arith.constant 0 : index
    %103 = vector.load %arg1[%c4, %c0_20, %c0_21] : memref<36x8x1xf32, #tpu.memory_space<vmem>>, vector<1x8x1xf32>
    %104 = vector.shape_cast %103 : vector<1x8x1xf32> to vector<8x1xf32>
    %105 = vector.extract_strided_slice %102 {offsets = [0, 0, 0], sizes = [1, 1, 256], strides = [1, 1, 1]} : vector<2x4x256xf32> to vector<1x1x256xf32>
    %106 = vector.shape_cast %105 : vector<1x1x256xf32> to vector<256xf32>
    %107 = vector.shape_cast %106 : vector<256xf32> to vector<1x256xf32>
    %108 = vector.broadcast %104 : vector<8x1xf32> to vector<8x256xf32>
    %109 = vector.broadcast %107 : vector<1x256xf32> to vector<8x256xf32>
    %110 = arith.mulf %108, %109 : vector<8x256xf32>
    %111 = arith.addf %90, %110 : vector<8x256xf32>
    %112 = vector.extract_strided_slice %102 {offsets = [1, 0, 0], sizes = [1, 1, 256], strides = [1, 1, 1]} : vector<2x4x256xf32> to vector<1x1x256xf32>
    %113 = vector.shape_cast %112 : vector<1x1x256xf32> to vector<256xf32>
    %114 = vector.shape_cast %113 : vector<256xf32> to vector<1x256xf32>
    %115 = vector.broadcast %104 : vector<8x1xf32> to vector<8x256xf32>
    %116 = vector.broadcast %114 : vector<1x256xf32> to vector<8x256xf32>
    %117 = arith.mulf %115, %116 : vector<8x256xf32>
    %118 = arith.addf %97, %117 : vector<8x256xf32>
    %c5 = arith.constant 5 : index
    %c0_22 = arith.constant 0 : index
    %c0_23 = arith.constant 0 : index
    %119 = vector.load %arg1[%c5, %c0_22, %c0_23] : memref<36x8x1xf32, #tpu.memory_space<vmem>>, vector<1x8x1xf32>
    %120 = vector.shape_cast %119 : vector<1x8x1xf32> to vector<8x1xf32>
    %121 = vector.extract_strided_slice %102 {offsets = [0, 1, 0], sizes = [1, 1, 256], strides = [1, 1, 1]} : vector<2x4x256xf32> to vector<1x1x256xf32>
    %122 = vector.shape_cast %121 : vector<1x1x256xf32> to vector<256xf32>
    %123 = vector.shape_cast %122 : vector<256xf32> to vector<1x256xf32>
    %124 = vector.broadcast %120 : vector<8x1xf32> to vector<8x256xf32>
    %125 = vector.broadcast %123 : vector<1x256xf32> to vector<8x256xf32>
    %126 = arith.mulf %124, %125 : vector<8x256xf32>
    %127 = arith.addf %111, %126 : vector<8x256xf32>
    %128 = vector.extract_strided_slice %102 {offsets = [1, 1, 0], sizes = [1, 1, 256], strides = [1, 1, 1]} : vector<2x4x256xf32> to vector<1x1x256xf32>
    %129 = vector.shape_cast %128 : vector<1x1x256xf32> to vector<256xf32>
    %130 = vector.shape_cast %129 : vector<256xf32> to vector<1x256xf32>
    %131 = vector.broadcast %120 : vector<8x1xf32> to vector<8x256xf32>
    %132 = vector.broadcast %130 : vector<1x256xf32> to vector<8x256xf32>
    %133 = arith.mulf %131, %132 : vector<8x256xf32>
    %134 = arith.addf %118, %133 : vector<8x256xf32>
    %c6 = arith.constant 6 : index
    %c0_24 = arith.constant 0 : index
    %c0_25 = arith.constant 0 : index
    %135 = vector.load %arg1[%c6, %c0_24, %c0_25] : memref<36x8x1xf32, #tpu.memory_space<vmem>>, vector<1x8x1xf32>
    %136 = vector.shape_cast %135 : vector<1x8x1xf32> to vector<8x1xf32>
    %137 = vector.extract_strided_slice %102 {offsets = [0, 2, 0], sizes = [1, 1, 256], strides = [1, 1, 1]} : vector<2x4x256xf32> to vector<1x1x256xf32>
    %138 = vector.shape_cast %137 : vector<1x1x256xf32> to vector<256xf32>
    %139 = vector.shape_cast %138 : vector<256xf32> to vector<1x256xf32>
    %140 = vector.broadcast %136 : vector<8x1xf32> to vector<8x256xf32>
    %141 = vector.broadcast %139 : vector<1x256xf32> to vector<8x256xf32>
    %142 = arith.mulf %140, %141 : vector<8x256xf32>
    %143 = arith.addf %127, %142 : vector<8x256xf32>
    %144 = vector.extract_strided_slice %102 {offsets = [1, 2, 0], sizes = [1, 1, 256], strides = [1, 1, 1]} : vector<2x4x256xf32> to vector<1x1x256xf32>
    %145 = vector.shape_cast %144 : vector<1x1x256xf32> to vector<256xf32>
    %146 = vector.shape_cast %145 : vector<256xf32> to vector<1x256xf32>
    %147 = vector.broadcast %136 : vector<8x1xf32> to vector<8x256xf32>
    %148 = vector.broadcast %146 : vector<1x256xf32> to vector<8x256xf32>
    %149 = arith.mulf %147, %148 : vector<8x256xf32>
    %150 = arith.addf %134, %149 : vector<8x256xf32>
    %c7 = arith.constant 7 : index
    %c0_26 = arith.constant 0 : index
    %c0_27 = arith.constant 0 : index
    %151 = vector.load %arg1[%c7, %c0_26, %c0_27] : memref<36x8x1xf32, #tpu.memory_space<vmem>>, vector<1x8x1xf32>
    %152 = vector.shape_cast %151 : vector<1x8x1xf32> to vector<8x1xf32>
    %153 = vector.extract_strided_slice %102 {offsets = [0, 3, 0], sizes = [1, 1, 256], strides = [1, 1, 1]} : vector<2x4x256xf32> to vector<1x1x256xf32>
    %154 = vector.shape_cast %153 : vector<1x1x256xf32> to vector<256xf32>
    %155 = vector.shape_cast %154 : vector<256xf32> to vector<1x256xf32>
    %156 = vector.broadcast %152 : vector<8x1xf32> to vector<8x256xf32>
    %157 = vector.broadcast %155 : vector<1x256xf32> to vector<8x256xf32>
    %158 = arith.mulf %156, %157 : vector<8x256xf32>
    %159 = arith.addf %143, %158 : vector<8x256xf32>
    %160 = vector.extract_strided_slice %102 {offsets = [1, 3, 0], sizes = [1, 1, 256], strides = [1, 1, 1]} : vector<2x4x256xf32> to vector<1x1x256xf32>
    %161 = vector.shape_cast %160 : vector<1x1x256xf32> to vector<256xf32>
    %162 = vector.shape_cast %161 : vector<256xf32> to vector<1x256xf32>
    %163 = vector.broadcast %152 : vector<8x1xf32> to vector<8x256xf32>
    %164 = vector.broadcast %162 : vector<1x256xf32> to vector<8x256xf32>
    %165 = arith.mulf %163, %164 : vector<8x256xf32>
    %166 = arith.addf %150, %165 : vector<8x256xf32>
    %c15_i32 = arith.constant 15 : i32
    %167 = tpu.dynamic_rotate %0 by %c15_i32 dim 2 : vector<2x4x256xf32>, i32 -> vector<2x4x256xf32>
    %168 = arith.andi %23, %21 : vector<1x1x256xi1>
    %cst_28 = arith.constant 0.000000e+00 : f32
    %169 = vector.shape_cast %168 : vector<1x1x256xi1> to vector<1x1x256xi1>
    %170 = vector.broadcast %169 : vector<1x1x256xi1> to vector<2x4x256xi1>
    %171 = vector.broadcast %cst_28 : f32 to vector<2x4x256xf32>
    %172 = arith.select %170, %167, %171 : vector<2x4x256xi1>, vector<2x4x256xf32>
    %c8 = arith.constant 8 : index
    %c0_29 = arith.constant 0 : index
    %c0_30 = arith.constant 0 : index
    %173 = vector.load %arg1[%c8, %c0_29, %c0_30] : memref<36x8x1xf32, #tpu.memory_space<vmem>>, vector<1x8x1xf32>
    %174 = vector.shape_cast %173 : vector<1x8x1xf32> to vector<8x1xf32>
    %175 = vector.extract_strided_slice %172 {offsets = [0, 0, 0], sizes = [1, 1, 256], strides = [1, 1, 1]} : vector<2x4x256xf32> to vector<1x1x256xf32>
    %176 = vector.shape_cast %175 : vector<1x1x256xf32> to vector<256xf32>
    %177 = vector.shape_cast %176 : vector<256xf32> to vector<1x256xf32>
    %178 = vector.broadcast %174 : vector<8x1xf32> to vector<8x256xf32>
    %179 = vector.broadcast %177 : vector<1x256xf32> to vector<8x256xf32>
    %180 = arith.mulf %178, %179 : vector<8x256xf32>
    %181 = arith.addf %159, %180 : vector<8x256xf32>
    %182 = vector.extract_strided_slice %172 {offsets = [1, 0, 0], sizes = [1, 1, 256], strides = [1, 1, 1]} : vector<2x4x256xf32> to vector<1x1x256xf32>
    %183 = vector.shape_cast %182 : vector<1x1x256xf32> to vector<256xf32>
    %184 = vector.shape_cast %183 : vector<256xf32> to vector<1x256xf32>
    %185 = vector.broadcast %174 : vector<8x1xf32> to vector<8x256xf32>
    %186 = vector.broadcast %184 : vector<1x256xf32> to vector<8x256xf32>
    %187 = arith.mulf %185, %186 : vector<8x256xf32>
    %188 = arith.addf %166, %187 : vector<8x256xf32>
    %c9 = arith.constant 9 : index
    %c0_31 = arith.constant 0 : index
    %c0_32 = arith.constant 0 : index
    %189 = vector.load %arg1[%c9, %c0_31, %c0_32] : memref<36x8x1xf32, #tpu.memory_space<vmem>>, vector<1x8x1xf32>
    %190 = vector.shape_cast %189 : vector<1x8x1xf32> to vector<8x1xf32>
    %191 = vector.extract_strided_slice %172 {offsets = [0, 1, 0], sizes = [1, 1, 256], strides = [1, 1, 1]} : vector<2x4x256xf32> to vector<1x1x256xf32>
    %192 = vector.shape_cast %191 : vector<1x1x256xf32> to vector<256xf32>
    %193 = vector.shape_cast %192 : vector<256xf32> to vector<1x256xf32>
    %194 = vector.broadcast %190 : vector<8x1xf32> to vector<8x256xf32>
    %195 = vector.broadcast %193 : vector<1x256xf32> to vector<8x256xf32>
    %196 = arith.mulf %194, %195 : vector<8x256xf32>
    %197 = arith.addf %181, %196 : vector<8x256xf32>
    %198 = vector.extract_strided_slice %172 {offsets = [1, 1, 0], sizes = [1, 1, 256], strides = [1, 1, 1]} : vector<2x4x256xf32> to vector<1x1x256xf32>
    %199 = vector.shape_cast %198 : vector<1x1x256xf32> to vector<256xf32>
    %200 = vector.shape_cast %199 : vector<256xf32> to vector<1x256xf32>
    %201 = vector.broadcast %190 : vector<8x1xf32> to vector<8x256xf32>
    %202 = vector.broadcast %200 : vector<1x256xf32> to vector<8x256xf32>
    %203 = arith.mulf %201, %202 : vector<8x256xf32>
    %204 = arith.addf %188, %203 : vector<8x256xf32>
    %c10 = arith.constant 10 : index
    %c0_33 = arith.constant 0 : index
    %c0_34 = arith.constant 0 : index
    %205 = vector.load %arg1[%c10, %c0_33, %c0_34] : memref<36x8x1xf32, #tpu.memory_space<vmem>>, vector<1x8x1xf32>
    %206 = vector.shape_cast %205 : vector<1x8x1xf32> to vector<8x1xf32>
    %207 = vector.extract_strided_slice %172 {offsets = [0, 2, 0], sizes = [1, 1, 256], strides = [1, 1, 1]} : vector<2x4x256xf32> to vector<1x1x256xf32>
    %208 = vector.shape_cast %207 : vector<1x1x256xf32> to vector<256xf32>
    %209 = vector.shape_cast %208 : vector<256xf32> to vector<1x256xf32>
    %210 = vector.broadcast %206 : vector<8x1xf32> to vector<8x256xf32>
    %211 = vector.broadcast %209 : vector<1x256xf32> to vector<8x256xf32>
    %212 = arith.mulf %210, %211 : vector<8x256xf32>
    %213 = arith.addf %197, %212 : vector<8x256xf32>
    %214 = vector.extract_strided_slice %172 {offsets = [1, 2, 0], sizes = [1, 1, 256], strides = [1, 1, 1]} : vector<2x4x256xf32> to vector<1x1x256xf32>
    %215 = vector.shape_cast %214 : vector<1x1x256xf32> to vector<256xf32>
    %216 = vector.shape_cast %215 : vector<256xf32> to vector<1x256xf32>
    %217 = vector.broadcast %206 : vector<8x1xf32> to vector<8x256xf32>
    %218 = vector.broadcast %216 : vector<1x256xf32> to vector<8x256xf32>
    %219 = arith.mulf %217, %218 : vector<8x256xf32>
    %220 = arith.addf %204, %219 : vector<8x256xf32>
    %c11 = arith.constant 11 : index
    %c0_35 = arith.constant 0 : index
    %c0_36 = arith.constant 0 : index
    %221 = vector.load %arg1[%c11, %c0_35, %c0_36] : memref<36x8x1xf32, #tpu.memory_space<vmem>>, vector<1x8x1xf32>
    %222 = vector.shape_cast %221 : vector<1x8x1xf32> to vector<8x1xf32>
    %223 = vector.extract_strided_slice %172 {offsets = [0, 3, 0], sizes = [1, 1, 256], strides = [1, 1, 1]} : vector<2x4x256xf32> to vector<1x1x256xf32>
    %224 = vector.shape_cast %223 : vector<1x1x256xf32> to vector<256xf32>
    %225 = vector.shape_cast %224 : vector<256xf32> to vector<1x256xf32>
    %226 = vector.broadcast %222 : vector<8x1xf32> to vector<8x256xf32>
    %227 = vector.broadcast %225 : vector<1x256xf32> to vector<8x256xf32>
    %228 = arith.mulf %226, %227 : vector<8x256xf32>
    %229 = arith.addf %213, %228 : vector<8x256xf32>
    %230 = vector.extract_strided_slice %172 {offsets = [1, 3, 0], sizes = [1, 1, 256], strides = [1, 1, 1]} : vector<2x4x256xf32> to vector<1x1x256xf32>
    %231 = vector.shape_cast %230 : vector<1x1x256xf32> to vector<256xf32>
    %232 = vector.shape_cast %231 : vector<256xf32> to vector<1x256xf32>
    %233 = vector.broadcast %222 : vector<8x1xf32> to vector<8x256xf32>
    %234 = vector.broadcast %232 : vector<1x256xf32> to vector<8x256xf32>
    %235 = arith.mulf %233, %234 : vector<8x256xf32>
    %236 = arith.addf %220, %235 : vector<8x256xf32>
    %c1_i32_37 = arith.constant 1 : i32
    %237 = tpu.dynamic_rotate %0 by %c1_i32_37 dim 2 : vector<2x4x256xf32>, i32 -> vector<2x4x256xf32>
    %cst_38 = arith.constant 0.000000e+00 : f32
    %238 = vector.shape_cast %19 : vector<1x1x256xi1> to vector<1x1x256xi1>
    %239 = vector.broadcast %238 : vector<1x1x256xi1> to vector<2x4x256xi1>
    %240 = vector.broadcast %cst_38 : f32 to vector<2x4x256xf32>
    %241 = arith.select %239, %237, %240 : vector<2x4x256xi1>, vector<2x4x256xf32>
    %c12 = arith.constant 12 : index
    %c0_39 = arith.constant 0 : index
    %c0_40 = arith.constant 0 : index
    %242 = vector.load %arg1[%c12, %c0_39, %c0_40] : memref<36x8x1xf32, #tpu.memory_space<vmem>>, vector<1x8x1xf32>
    %243 = vector.shape_cast %242 : vector<1x8x1xf32> to vector<8x1xf32>
    %244 = vector.extract_strided_slice %241 {offsets = [0, 0, 0], sizes = [1, 1, 256], strides = [1, 1, 1]} : vector<2x4x256xf32> to vector<1x1x256xf32>
    %245 = vector.shape_cast %244 : vector<1x1x256xf32> to vector<256xf32>
    %246 = vector.shape_cast %245 : vector<256xf32> to vector<1x256xf32>
    %247 = vector.broadcast %243 : vector<8x1xf32> to vector<8x256xf32>
    %248 = vector.broadcast %246 : vector<1x256xf32> to vector<8x256xf32>
    %249 = arith.mulf %247, %248 : vector<8x256xf32>
    %250 = arith.addf %229, %249 : vector<8x256xf32>
    %251 = vector.extract_strided_slice %241 {offsets = [1, 0, 0], sizes = [1, 1, 256], strides = [1, 1, 1]} : vector<2x4x256xf32> to vector<1x1x256xf32>
    %252 = vector.shape_cast %251 : vector<1x1x256xf32> to vector<256xf32>
    %253 = vector.shape_cast %252 : vector<256xf32> to vector<1x256xf32>
    %254 = vector.broadcast %243 : vector<8x1xf32> to vector<8x256xf32>
    %255 = vector.broadcast %253 : vector<1x256xf32> to vector<8x256xf32>
    %256 = arith.mulf %254, %255 : vector<8x256xf32>
    %257 = arith.addf %236, %256 : vector<8x256xf32>
    %c13 = arith.constant 13 : index
    %c0_41 = arith.constant 0 : index
    %c0_42 = arith.constant 0 : index
    %258 = vector.load %arg1[%c13, %c0_41, %c0_42] : memref<36x8x1xf32, #tpu.memory_space<vmem>>, vector<1x8x1xf32>
    %259 = vector.shape_cast %258 : vector<1x8x1xf32> to vector<8x1xf32>
    %260 = vector.extract_strided_slice %241 {offsets = [0, 1, 0], sizes = [1, 1, 256], strides = [1, 1, 1]} : vector<2x4x256xf32> to vector<1x1x256xf32>
    %261 = vector.shape_cast %260 : vector<1x1x256xf32> to vector<256xf32>
    %262 = vector.shape_cast %261 : vector<256xf32> to vector<1x256xf32>
    %263 = vector.broadcast %259 : vector<8x1xf32> to vector<8x256xf32>
    %264 = vector.broadcast %262 : vector<1x256xf32> to vector<8x256xf32>
    %265 = arith.mulf %263, %264 : vector<8x256xf32>
    %266 = arith.addf %250, %265 : vector<8x256xf32>
    %267 = vector.extract_strided_slice %241 {offsets = [1, 1, 0], sizes = [1, 1, 256], strides = [1, 1, 1]} : vector<2x4x256xf32> to vector<1x1x256xf32>
    %268 = vector.shape_cast %267 : vector<1x1x256xf32> to vector<256xf32>
    %269 = vector.shape_cast %268 : vector<256xf32> to vector<1x256xf32>
    %270 = vector.broadcast %259 : vector<8x1xf32> to vector<8x256xf32>
    %271 = vector.broadcast %269 : vector<1x256xf32> to vector<8x256xf32>
    %272 = arith.mulf %270, %271 : vector<8x256xf32>
    %273 = arith.addf %257, %272 : vector<8x256xf32>
    %c14 = arith.constant 14 : index
    %c0_43 = arith.constant 0 : index
    %c0_44 = arith.constant 0 : index
    %274 = vector.load %arg1[%c14, %c0_43, %c0_44] : memref<36x8x1xf32, #tpu.memory_space<vmem>>, vector<1x8x1xf32>
    %275 = vector.shape_cast %274 : vector<1x8x1xf32> to vector<8x1xf32>
    %276 = vector.extract_strided_slice %241 {offsets = [0, 2, 0], sizes = [1, 1, 256], strides = [1, 1, 1]} : vector<2x4x256xf32> to vector<1x1x256xf32>
    %277 = vector.shape_cast %276 : vector<1x1x256xf32> to vector<256xf32>
    %278 = vector.shape_cast %277 : vector<256xf32> to vector<1x256xf32>
    %279 = vector.broadcast %275 : vector<8x1xf32> to vector<8x256xf32>
    %280 = vector.broadcast %278 : vector<1x256xf32> to vector<8x256xf32>
    %281 = arith.mulf %279, %280 : vector<8x256xf32>
    %282 = arith.addf %266, %281 : vector<8x256xf32>
    %283 = vector.extract_strided_slice %241 {offsets = [1, 2, 0], sizes = [1, 1, 256], strides = [1, 1, 1]} : vector<2x4x256xf32> to vector<1x1x256xf32>
    %284 = vector.shape_cast %283 : vector<1x1x256xf32> to vector<256xf32>
    %285 = vector.shape_cast %284 : vector<256xf32> to vector<1x256xf32>
    %286 = vector.broadcast %275 : vector<8x1xf32> to vector<8x256xf32>
    %287 = vector.broadcast %285 : vector<1x256xf32> to vector<8x256xf32>
    %288 = arith.mulf %286, %287 : vector<8x256xf32>
    %289 = arith.addf %273, %288 : vector<8x256xf32>
    %c15 = arith.constant 15 : index
    %c0_45 = arith.constant 0 : index
    %c0_46 = arith.constant 0 : index
    %290 = vector.load %arg1[%c15, %c0_45, %c0_46] : memref<36x8x1xf32, #tpu.memory_space<vmem>>, vector<1x8x1xf32>
    %291 = vector.shape_cast %290 : vector<1x8x1xf32> to vector<8x1xf32>
    %292 = vector.extract_strided_slice %241 {offsets = [0, 3, 0], sizes = [1, 1, 256], strides = [1, 1, 1]} : vector<2x4x256xf32> to vector<1x1x256xf32>
    %293 = vector.shape_cast %292 : vector<1x1x256xf32> to vector<256xf32>
    %294 = vector.shape_cast %293 : vector<256xf32> to vector<1x256xf32>
    %295 = vector.broadcast %291 : vector<8x1xf32> to vector<8x256xf32>
    %296 = vector.broadcast %294 : vector<1x256xf32> to vector<8x256xf32>
    %297 = arith.mulf %295, %296 : vector<8x256xf32>
    %298 = arith.addf %282, %297 : vector<8x256xf32>
    %299 = vector.extract_strided_slice %241 {offsets = [1, 3, 0], sizes = [1, 1, 256], strides = [1, 1, 1]} : vector<2x4x256xf32> to vector<1x1x256xf32>
    %300 = vector.shape_cast %299 : vector<1x1x256xf32> to vector<256xf32>
    %301 = vector.shape_cast %300 : vector<256xf32> to vector<1x256xf32>
    %302 = vector.broadcast %291 : vector<8x1xf32> to vector<8x256xf32>
    %303 = vector.broadcast %301 : vector<1x256xf32> to vector<8x256xf32>
    %304 = arith.mulf %302, %303 : vector<8x256xf32>
    %305 = arith.addf %289, %304 : vector<8x256xf32>
    %c16 = arith.constant 16 : index
    %c0_47 = arith.constant 0 : index
    %c0_48 = arith.constant 0 : index
    %306 = vector.load %arg1[%c16, %c0_47, %c0_48] : memref<36x8x1xf32, #tpu.memory_space<vmem>>, vector<1x8x1xf32>
    %307 = vector.shape_cast %306 : vector<1x8x1xf32> to vector<8x1xf32>
    %308 = vector.extract_strided_slice %0 {offsets = [0, 0, 0], sizes = [1, 1, 256], strides = [1, 1, 1]} : vector<2x4x256xf32> to vector<1x1x256xf32>
    %309 = vector.shape_cast %308 : vector<1x1x256xf32> to vector<256xf32>
    %310 = vector.shape_cast %309 : vector<256xf32> to vector<1x256xf32>
    %311 = vector.broadcast %307 : vector<8x1xf32> to vector<8x256xf32>
    %312 = vector.broadcast %310 : vector<1x256xf32> to vector<8x256xf32>
    %313 = arith.mulf %311, %312 : vector<8x256xf32>
    %314 = arith.addf %298, %313 : vector<8x256xf32>
    %315 = vector.extract_strided_slice %0 {offsets = [1, 0, 0], sizes = [1, 1, 256], strides = [1, 1, 1]} : vector<2x4x256xf32> to vector<1x1x256xf32>
    %316 = vector.shape_cast %315 : vector<1x1x256xf32> to vector<256xf32>
    %317 = vector.shape_cast %316 : vector<256xf32> to vector<1x256xf32>
    %318 = vector.broadcast %307 : vector<8x1xf32> to vector<8x256xf32>
    %319 = vector.broadcast %317 : vector<1x256xf32> to vector<8x256xf32>
    %320 = arith.mulf %318, %319 : vector<8x256xf32>
    %321 = arith.addf %305, %320 : vector<8x256xf32>
    %c17 = arith.constant 17 : index
    %c0_49 = arith.constant 0 : index
    %c0_50 = arith.constant 0 : index
    %322 = vector.load %arg1[%c17, %c0_49, %c0_50] : memref<36x8x1xf32, #tpu.memory_space<vmem>>, vector<1x8x1xf32>
    %323 = vector.shape_cast %322 : vector<1x8x1xf32> to vector<8x1xf32>
    %324 = vector.extract_strided_slice %0 {offsets = [0, 1, 0], sizes = [1, 1, 256], strides = [1, 1, 1]} : vector<2x4x256xf32> to vector<1x1x256xf32>
    %325 = vector.shape_cast %324 : vector<1x1x256xf32> to vector<256xf32>
    %326 = vector.shape_cast %325 : vector<256xf32> to vector<1x256xf32>
    %327 = vector.broadcast %323 : vector<8x1xf32> to vector<8x256xf32>
    %328 = vector.broadcast %326 : vector<1x256xf32> to vector<8x256xf32>
    %329 = arith.mulf %327, %328 : vector<8x256xf32>
    %330 = arith.addf %314, %329 : vector<8x256xf32>
    %331 = vector.extract_strided_slice %0 {offsets = [1, 1, 0], sizes = [1, 1, 256], strides = [1, 1, 1]} : vector<2x4x256xf32> to vector<1x1x256xf32>
    %332 = vector.shape_cast %331 : vector<1x1x256xf32> to vector<256xf32>
    %333 = vector.shape_cast %332 : vector<256xf32> to vector<1x256xf32>
    %334 = vector.broadcast %323 : vector<8x1xf32> to vector<8x256xf32>
    %335 = vector.broadcast %333 : vector<1x256xf32> to vector<8x256xf32>
    %336 = arith.mulf %334, %335 : vector<8x256xf32>
    %337 = arith.addf %321, %336 : vector<8x256xf32>
    %c18 = arith.constant 18 : index
    %c0_51 = arith.constant 0 : index
    %c0_52 = arith.constant 0 : index
    %338 = vector.load %arg1[%c18, %c0_51, %c0_52] : memref<36x8x1xf32, #tpu.memory_space<vmem>>, vector<1x8x1xf32>
    %339 = vector.shape_cast %338 : vector<1x8x1xf32> to vector<8x1xf32>
    %340 = vector.extract_strided_slice %0 {offsets = [0, 2, 0], sizes = [1, 1, 256], strides = [1, 1, 1]} : vector<2x4x256xf32> to vector<1x1x256xf32>
    %341 = vector.shape_cast %340 : vector<1x1x256xf32> to vector<256xf32>
    %342 = vector.shape_cast %341 : vector<256xf32> to vector<1x256xf32>
    %343 = vector.broadcast %339 : vector<8x1xf32> to vector<8x256xf32>
    %344 = vector.broadcast %342 : vector<1x256xf32> to vector<8x256xf32>
    %345 = arith.mulf %343, %344 : vector<8x256xf32>
    %346 = arith.addf %330, %345 : vector<8x256xf32>
    %347 = vector.extract_strided_slice %0 {offsets = [1, 2, 0], sizes = [1, 1, 256], strides = [1, 1, 1]} : vector<2x4x256xf32> to vector<1x1x256xf32>
    %348 = vector.shape_cast %347 : vector<1x1x256xf32> to vector<256xf32>
    %349 = vector.shape_cast %348 : vector<256xf32> to vector<1x256xf32>
    %350 = vector.broadcast %339 : vector<8x1xf32> to vector<8x256xf32>
    %351 = vector.broadcast %349 : vector<1x256xf32> to vector<8x256xf32>
    %352 = arith.mulf %350, %351 : vector<8x256xf32>
    %353 = arith.addf %337, %352 : vector<8x256xf32>
    %c19 = arith.constant 19 : index
    %c0_53 = arith.constant 0 : index
    %c0_54 = arith.constant 0 : index
    %354 = vector.load %arg1[%c19, %c0_53, %c0_54] : memref<36x8x1xf32, #tpu.memory_space<vmem>>, vector<1x8x1xf32>
    %355 = vector.shape_cast %354 : vector<1x8x1xf32> to vector<8x1xf32>
    %356 = vector.extract_strided_slice %0 {offsets = [0, 3, 0], sizes = [1, 1, 256], strides = [1, 1, 1]} : vector<2x4x256xf32> to vector<1x1x256xf32>
    %357 = vector.shape_cast %356 : vector<1x1x256xf32> to vector<256xf32>
    %358 = vector.shape_cast %357 : vector<256xf32> to vector<1x256xf32>
    %359 = vector.broadcast %355 : vector<8x1xf32> to vector<8x256xf32>
    %360 = vector.broadcast %358 : vector<1x256xf32> to vector<8x256xf32>
    %361 = arith.mulf %359, %360 : vector<8x256xf32>
    %362 = arith.addf %346, %361 : vector<8x256xf32>
    %363 = vector.extract_strided_slice %0 {offsets = [1, 3, 0], sizes = [1, 1, 256], strides = [1, 1, 1]} : vector<2x4x256xf32> to vector<1x1x256xf32>
    %364 = vector.shape_cast %363 : vector<1x1x256xf32> to vector<256xf32>
    %365 = vector.shape_cast %364 : vector<256xf32> to vector<1x256xf32>
    %366 = vector.broadcast %355 : vector<8x1xf32> to vector<8x256xf32>
    %367 = vector.broadcast %365 : vector<1x256xf32> to vector<8x256xf32>
    %368 = arith.mulf %366, %367 : vector<8x256xf32>
    %369 = arith.addf %353, %368 : vector<8x256xf32>
    %c255_i32 = arith.constant 255 : i32
    %370 = tpu.dynamic_rotate %0 by %c255_i32 dim 2 : vector<2x4x256xf32>, i32 -> vector<2x4x256xf32>
    %cst_55 = arith.constant 0.000000e+00 : f32
    %371 = vector.shape_cast %21 : vector<1x1x256xi1> to vector<1x1x256xi1>
    %372 = vector.broadcast %371 : vector<1x1x256xi1> to vector<2x4x256xi1>
    %373 = vector.broadcast %cst_55 : f32 to vector<2x4x256xf32>
    %374 = arith.select %372, %370, %373 : vector<2x4x256xi1>, vector<2x4x256xf32>
    %c20 = arith.constant 20 : index
    %c0_56 = arith.constant 0 : index
    %c0_57 = arith.constant 0 : index
    %375 = vector.load %arg1[%c20, %c0_56, %c0_57] : memref<36x8x1xf32, #tpu.memory_space<vmem>>, vector<1x8x1xf32>
    %376 = vector.shape_cast %375 : vector<1x8x1xf32> to vector<8x1xf32>
    %377 = vector.extract_strided_slice %374 {offsets = [0, 0, 0], sizes = [1, 1, 256], strides = [1, 1, 1]} : vector<2x4x256xf32> to vector<1x1x256xf32>
    %378 = vector.shape_cast %377 : vector<1x1x256xf32> to vector<256xf32>
    %379 = vector.shape_cast %378 : vector<256xf32> to vector<1x256xf32>
    %380 = vector.broadcast %376 : vector<8x1xf32> to vector<8x256xf32>
    %381 = vector.broadcast %379 : vector<1x256xf32> to vector<8x256xf32>
    %382 = arith.mulf %380, %381 : vector<8x256xf32>
    %383 = arith.addf %362, %382 : vector<8x256xf32>
    %384 = vector.extract_strided_slice %374 {offsets = [1, 0, 0], sizes = [1, 1, 256], strides = [1, 1, 1]} : vector<2x4x256xf32> to vector<1x1x256xf32>
    %385 = vector.shape_cast %384 : vector<1x1x256xf32> to vector<256xf32>
    %386 = vector.shape_cast %385 : vector<256xf32> to vector<1x256xf32>
    %387 = vector.broadcast %376 : vector<8x1xf32> to vector<8x256xf32>
    %388 = vector.broadcast %386 : vector<1x256xf32> to vector<8x256xf32>
    %389 = arith.mulf %387, %388 : vector<8x256xf32>
    %390 = arith.addf %369, %389 : vector<8x256xf32>
    %c21 = arith.constant 21 : index
    %c0_58 = arith.constant 0 : index
    %c0_59 = arith.constant 0 : index
    %391 = vector.load %arg1[%c21, %c0_58, %c0_59] : memref<36x8x1xf32, #tpu.memory_space<vmem>>, vector<1x8x1xf32>
    %392 = vector.shape_cast %391 : vector<1x8x1xf32> to vector<8x1xf32>
    %393 = vector.extract_strided_slice %374 {offsets = [0, 1, 0], sizes = [1, 1, 256], strides = [1, 1, 1]} : vector<2x4x256xf32> to vector<1x1x256xf32>
    %394 = vector.shape_cast %393 : vector<1x1x256xf32> to vector<256xf32>
    %395 = vector.shape_cast %394 : vector<256xf32> to vector<1x256xf32>
    %396 = vector.broadcast %392 : vector<8x1xf32> to vector<8x256xf32>
    %397 = vector.broadcast %395 : vector<1x256xf32> to vector<8x256xf32>
    %398 = arith.mulf %396, %397 : vector<8x256xf32>
    %399 = arith.addf %383, %398 : vector<8x256xf32>
    %400 = vector.extract_strided_slice %374 {offsets = [1, 1, 0], sizes = [1, 1, 256], strides = [1, 1, 1]} : vector<2x4x256xf32> to vector<1x1x256xf32>
    %401 = vector.shape_cast %400 : vector<1x1x256xf32> to vector<256xf32>
    %402 = vector.shape_cast %401 : vector<256xf32> to vector<1x256xf32>
    %403 = vector.broadcast %392 : vector<8x1xf32> to vector<8x256xf32>
    %404 = vector.broadcast %402 : vector<1x256xf32> to vector<8x256xf32>
    %405 = arith.mulf %403, %404 : vector<8x256xf32>
    %406 = arith.addf %390, %405 : vector<8x256xf32>
    %c22 = arith.constant 22 : index
    %c0_60 = arith.constant 0 : index
    %c0_61 = arith.constant 0 : index
    %407 = vector.load %arg1[%c22, %c0_60, %c0_61] : memref<36x8x1xf32, #tpu.memory_space<vmem>>, vector<1x8x1xf32>
    %408 = vector.shape_cast %407 : vector<1x8x1xf32> to vector<8x1xf32>
    %409 = vector.extract_strided_slice %374 {offsets = [0, 2, 0], sizes = [1, 1, 256], strides = [1, 1, 1]} : vector<2x4x256xf32> to vector<1x1x256xf32>
    %410 = vector.shape_cast %409 : vector<1x1x256xf32> to vector<256xf32>
    %411 = vector.shape_cast %410 : vector<256xf32> to vector<1x256xf32>
    %412 = vector.broadcast %408 : vector<8x1xf32> to vector<8x256xf32>
    %413 = vector.broadcast %411 : vector<1x256xf32> to vector<8x256xf32>
    %414 = arith.mulf %412, %413 : vector<8x256xf32>
    %415 = arith.addf %399, %414 : vector<8x256xf32>
    %416 = vector.extract_strided_slice %374 {offsets = [1, 2, 0], sizes = [1, 1, 256], strides = [1, 1, 1]} : vector<2x4x256xf32> to vector<1x1x256xf32>
    %417 = vector.shape_cast %416 : vector<1x1x256xf32> to vector<256xf32>
    %418 = vector.shape_cast %417 : vector<256xf32> to vector<1x256xf32>
    %419 = vector.broadcast %408 : vector<8x1xf32> to vector<8x256xf32>
    %420 = vector.broadcast %418 : vector<1x256xf32> to vector<8x256xf32>
    %421 = arith.mulf %419, %420 : vector<8x256xf32>
    %422 = arith.addf %406, %421 : vector<8x256xf32>
    %c23 = arith.constant 23 : index
    %c0_62 = arith.constant 0 : index
    %c0_63 = arith.constant 0 : index
    %423 = vector.load %arg1[%c23, %c0_62, %c0_63] : memref<36x8x1xf32, #tpu.memory_space<vmem>>, vector<1x8x1xf32>
    %424 = vector.shape_cast %423 : vector<1x8x1xf32> to vector<8x1xf32>
    %425 = vector.extract_strided_slice %374 {offsets = [0, 3, 0], sizes = [1, 1, 256], strides = [1, 1, 1]} : vector<2x4x256xf32> to vector<1x1x256xf32>
    %426 = vector.shape_cast %425 : vector<1x1x256xf32> to vector<256xf32>
    %427 = vector.shape_cast %426 : vector<256xf32> to vector<1x256xf32>
    %428 = vector.broadcast %424 : vector<8x1xf32> to vector<8x256xf32>
    %429 = vector.broadcast %427 : vector<1x256xf32> to vector<8x256xf32>
    %430 = arith.mulf %428, %429 : vector<8x256xf32>
    %431 = arith.addf %415, %430 : vector<8x256xf32>
    %432 = vector.extract_strided_slice %374 {offsets = [1, 3, 0], sizes = [1, 1, 256], strides = [1, 1, 1]} : vector<2x4x256xf32> to vector<1x1x256xf32>
    %433 = vector.shape_cast %432 : vector<1x1x256xf32> to vector<256xf32>
    %434 = vector.shape_cast %433 : vector<256xf32> to vector<1x256xf32>
    %435 = vector.broadcast %424 : vector<8x1xf32> to vector<8x256xf32>
    %436 = vector.broadcast %434 : vector<1x256xf32> to vector<8x256xf32>
    %437 = arith.mulf %435, %436 : vector<8x256xf32>
    %438 = arith.addf %422, %437 : vector<8x256xf32>
    %c241_i32 = arith.constant 241 : i32
    %439 = tpu.dynamic_rotate %0 by %c241_i32 dim 2 : vector<2x4x256xf32>, i32 -> vector<2x4x256xf32>
    %440 = arith.andi %25, %19 : vector<1x1x256xi1>
    %cst_64 = arith.constant 0.000000e+00 : f32
    %441 = vector.shape_cast %440 : vector<1x1x256xi1> to vector<1x1x256xi1>
    %442 = vector.broadcast %441 : vector<1x1x256xi1> to vector<2x4x256xi1>
    %443 = vector.broadcast %cst_64 : f32 to vector<2x4x256xf32>
    %444 = arith.select %442, %439, %443 : vector<2x4x256xi1>, vector<2x4x256xf32>
    %c24 = arith.constant 24 : index
    %c0_65 = arith.constant 0 : index
    %c0_66 = arith.constant 0 : index
    %445 = vector.load %arg1[%c24, %c0_65, %c0_66] : memref<36x8x1xf32, #tpu.memory_space<vmem>>, vector<1x8x1xf32>
    %446 = vector.shape_cast %445 : vector<1x8x1xf32> to vector<8x1xf32>
    %447 = vector.extract_strided_slice %444 {offsets = [0, 0, 0], sizes = [1, 1, 256], strides = [1, 1, 1]} : vector<2x4x256xf32> to vector<1x1x256xf32>
    %448 = vector.shape_cast %447 : vector<1x1x256xf32> to vector<256xf32>
    %449 = vector.shape_cast %448 : vector<256xf32> to vector<1x256xf32>
    %450 = vector.broadcast %446 : vector<8x1xf32> to vector<8x256xf32>
    %451 = vector.broadcast %449 : vector<1x256xf32> to vector<8x256xf32>
    %452 = arith.mulf %450, %451 : vector<8x256xf32>
    %453 = arith.addf %431, %452 : vector<8x256xf32>
    %454 = vector.extract_strided_slice %444 {offsets = [1, 0, 0], sizes = [1, 1, 256], strides = [1, 1, 1]} : vector<2x4x256xf32> to vector<1x1x256xf32>
    %455 = vector.shape_cast %454 : vector<1x1x256xf32> to vector<256xf32>
    %456 = vector.shape_cast %455 : vector<256xf32> to vector<1x256xf32>
    %457 = vector.broadcast %446 : vector<8x1xf32> to vector<8x256xf32>
    %458 = vector.broadcast %456 : vector<1x256xf32> to vector<8x256xf32>
    %459 = arith.mulf %457, %458 : vector<8x256xf32>
    %460 = arith.addf %438, %459 : vector<8x256xf32>
    %c25 = arith.constant 25 : index
    %c0_67 = arith.constant 0 : index
    %c0_68 = arith.constant 0 : index
    %461 = vector.load %arg1[%c25, %c0_67, %c0_68] : memref<36x8x1xf32, #tpu.memory_space<vmem>>, vector<1x8x1xf32>
    %462 = vector.shape_cast %461 : vector<1x8x1xf32> to vector<8x1xf32>
    %463 = vector.extract_strided_slice %444 {offsets = [0, 1, 0], sizes = [1, 1, 256], strides = [1, 1, 1]} : vector<2x4x256xf32> to vector<1x1x256xf32>
    %464 = vector.shape_cast %463 : vector<1x1x256xf32> to vector<256xf32>
    %465 = vector.shape_cast %464 : vector<256xf32> to vector<1x256xf32>
    %466 = vector.broadcast %462 : vector<8x1xf32> to vector<8x256xf32>
    %467 = vector.broadcast %465 : vector<1x256xf32> to vector<8x256xf32>
    %468 = arith.mulf %466, %467 : vector<8x256xf32>
    %469 = arith.addf %453, %468 : vector<8x256xf32>
    %470 = vector.extract_strided_slice %444 {offsets = [1, 1, 0], sizes = [1, 1, 256], strides = [1, 1, 1]} : vector<2x4x256xf32> to vector<1x1x256xf32>
    %471 = vector.shape_cast %470 : vector<1x1x256xf32> to vector<256xf32>
    %472 = vector.shape_cast %471 : vector<256xf32> to vector<1x256xf32>
    %473 = vector.broadcast %462 : vector<8x1xf32> to vector<8x256xf32>
    %474 = vector.broadcast %472 : vector<1x256xf32> to vector<8x256xf32>
    %475 = arith.mulf %473, %474 : vector<8x256xf32>
    %476 = arith.addf %460, %475 : vector<8x256xf32>
    %c26 = arith.constant 26 : index
    %c0_69 = arith.constant 0 : index
    %c0_70 = arith.constant 0 : index
    %477 = vector.load %arg1[%c26, %c0_69, %c0_70] : memref<36x8x1xf32, #tpu.memory_space<vmem>>, vector<1x8x1xf32>
    %478 = vector.shape_cast %477 : vector<1x8x1xf32> to vector<8x1xf32>
    %479 = vector.extract_strided_slice %444 {offsets = [0, 2, 0], sizes = [1, 1, 256], strides = [1, 1, 1]} : vector<2x4x256xf32> to vector<1x1x256xf32>
    %480 = vector.shape_cast %479 : vector<1x1x256xf32> to vector<256xf32>
    %481 = vector.shape_cast %480 : vector<256xf32> to vector<1x256xf32>
    %482 = vector.broadcast %478 : vector<8x1xf32> to vector<8x256xf32>
    %483 = vector.broadcast %481 : vector<1x256xf32> to vector<8x256xf32>
    %484 = arith.mulf %482, %483 : vector<8x256xf32>
    %485 = arith.addf %469, %484 : vector<8x256xf32>
    %486 = vector.extract_strided_slice %444 {offsets = [1, 2, 0], sizes = [1, 1, 256], strides = [1, 1, 1]} : vector<2x4x256xf32> to vector<1x1x256xf32>
    %487 = vector.shape_cast %486 : vector<1x1x256xf32> to vector<256xf32>
    %488 = vector.shape_cast %487 : vector<256xf32> to vector<1x256xf32>
    %489 = vector.broadcast %478 : vector<8x1xf32> to vector<8x256xf32>
    %490 = vector.broadcast %488 : vector<1x256xf32> to vector<8x256xf32>
    %491 = arith.mulf %489, %490 : vector<8x256xf32>
    %492 = arith.addf %476, %491 : vector<8x256xf32>
    %c27 = arith.constant 27 : index
    %c0_71 = arith.constant 0 : index
    %c0_72 = arith.constant 0 : index
    %493 = vector.load %arg1[%c27, %c0_71, %c0_72] : memref<36x8x1xf32, #tpu.memory_space<vmem>>, vector<1x8x1xf32>
    %494 = vector.shape_cast %493 : vector<1x8x1xf32> to vector<8x1xf32>
    %495 = vector.extract_strided_slice %444 {offsets = [0, 3, 0], sizes = [1, 1, 256], strides = [1, 1, 1]} : vector<2x4x256xf32> to vector<1x1x256xf32>
    %496 = vector.shape_cast %495 : vector<1x1x256xf32> to vector<256xf32>
    %497 = vector.shape_cast %496 : vector<256xf32> to vector<1x256xf32>
    %498 = vector.broadcast %494 : vector<8x1xf32> to vector<8x256xf32>
    %499 = vector.broadcast %497 : vector<1x256xf32> to vector<8x256xf32>
    %500 = arith.mulf %498, %499 : vector<8x256xf32>
    %501 = arith.addf %485, %500 : vector<8x256xf32>
    %502 = vector.extract_strided_slice %444 {offsets = [1, 3, 0], sizes = [1, 1, 256], strides = [1, 1, 1]} : vector<2x4x256xf32> to vector<1x1x256xf32>
    %503 = vector.shape_cast %502 : vector<1x1x256xf32> to vector<256xf32>
    %504 = vector.shape_cast %503 : vector<256xf32> to vector<1x256xf32>
    %505 = vector.broadcast %494 : vector<8x1xf32> to vector<8x256xf32>
    %506 = vector.broadcast %504 : vector<1x256xf32> to vector<8x256xf32>
    %507 = arith.mulf %505, %506 : vector<8x256xf32>
    %508 = arith.addf %492, %507 : vector<8x256xf32>
    %c240_i32_73 = arith.constant 240 : i32
    %509 = tpu.dynamic_rotate %0 by %c240_i32_73 dim 2 : vector<2x4x256xf32>, i32 -> vector<2x4x256xf32>
    %cst_74 = arith.constant 0.000000e+00 : f32
    %510 = vector.shape_cast %25 : vector<1x1x256xi1> to vector<1x1x256xi1>
    %511 = vector.broadcast %510 : vector<1x1x256xi1> to vector<2x4x256xi1>
    %512 = vector.broadcast %cst_74 : f32 to vector<2x4x256xf32>
    %513 = arith.select %511, %509, %512 : vector<2x4x256xi1>, vector<2x4x256xf32>
    %c28 = arith.constant 28 : index
    %c0_75 = arith.constant 0 : index
    %c0_76 = arith.constant 0 : index
    %514 = vector.load %arg1[%c28, %c0_75, %c0_76] : memref<36x8x1xf32, #tpu.memory_space<vmem>>, vector<1x8x1xf32>
    %515 = vector.shape_cast %514 : vector<1x8x1xf32> to vector<8x1xf32>
    %516 = vector.extract_strided_slice %513 {offsets = [0, 0, 0], sizes = [1, 1, 256], strides = [1, 1, 1]} : vector<2x4x256xf32> to vector<1x1x256xf32>
    %517 = vector.shape_cast %516 : vector<1x1x256xf32> to vector<256xf32>
    %518 = vector.shape_cast %517 : vector<256xf32> to vector<1x256xf32>
    %519 = vector.broadcast %515 : vector<8x1xf32> to vector<8x256xf32>
    %520 = vector.broadcast %518 : vector<1x256xf32> to vector<8x256xf32>
    %521 = arith.mulf %519, %520 : vector<8x256xf32>
    %522 = arith.addf %501, %521 : vector<8x256xf32>
    %523 = vector.extract_strided_slice %513 {offsets = [1, 0, 0], sizes = [1, 1, 256], strides = [1, 1, 1]} : vector<2x4x256xf32> to vector<1x1x256xf32>
    %524 = vector.shape_cast %523 : vector<1x1x256xf32> to vector<256xf32>
    %525 = vector.shape_cast %524 : vector<256xf32> to vector<1x256xf32>
    %526 = vector.broadcast %515 : vector<8x1xf32> to vector<8x256xf32>
    %527 = vector.broadcast %525 : vector<1x256xf32> to vector<8x256xf32>
    %528 = arith.mulf %526, %527 : vector<8x256xf32>
    %529 = arith.addf %508, %528 : vector<8x256xf32>
    %c29 = arith.constant 29 : index
    %c0_77 = arith.constant 0 : index
    %c0_78 = arith.constant 0 : index
    %530 = vector.load %arg1[%c29, %c0_77, %c0_78] : memref<36x8x1xf32, #tpu.memory_space<vmem>>, vector<1x8x1xf32>
    %531 = vector.shape_cast %530 : vector<1x8x1xf32> to vector<8x1xf32>
    %532 = vector.extract_strided_slice %513 {offsets = [0, 1, 0], sizes = [1, 1, 256], strides = [1, 1, 1]} : vector<2x4x256xf32> to vector<1x1x256xf32>
    %533 = vector.shape_cast %532 : vector<1x1x256xf32> to vector<256xf32>
    %534 = vector.shape_cast %533 : vector<256xf32> to vector<1x256xf32>
    %535 = vector.broadcast %531 : vector<8x1xf32> to vector<8x256xf32>
    %536 = vector.broadcast %534 : vector<1x256xf32> to vector<8x256xf32>
    %537 = arith.mulf %535, %536 : vector<8x256xf32>
    %538 = arith.addf %522, %537 : vector<8x256xf32>
    %539 = vector.extract_strided_slice %513 {offsets = [1, 1, 0], sizes = [1, 1, 256], strides = [1, 1, 1]} : vector<2x4x256xf32> to vector<1x1x256xf32>
    %540 = vector.shape_cast %539 : vector<1x1x256xf32> to vector<256xf32>
    %541 = vector.shape_cast %540 : vector<256xf32> to vector<1x256xf32>
    %542 = vector.broadcast %531 : vector<8x1xf32> to vector<8x256xf32>
    %543 = vector.broadcast %541 : vector<1x256xf32> to vector<8x256xf32>
    %544 = arith.mulf %542, %543 : vector<8x256xf32>
    %545 = arith.addf %529, %544 : vector<8x256xf32>
    %c30 = arith.constant 30 : index
    %c0_79 = arith.constant 0 : index
    %c0_80 = arith.constant 0 : index
    %546 = vector.load %arg1[%c30, %c0_79, %c0_80] : memref<36x8x1xf32, #tpu.memory_space<vmem>>, vector<1x8x1xf32>
    %547 = vector.shape_cast %546 : vector<1x8x1xf32> to vector<8x1xf32>
    %548 = vector.extract_strided_slice %513 {offsets = [0, 2, 0], sizes = [1, 1, 256], strides = [1, 1, 1]} : vector<2x4x256xf32> to vector<1x1x256xf32>
    %549 = vector.shape_cast %548 : vector<1x1x256xf32> to vector<256xf32>
    %550 = vector.shape_cast %549 : vector<256xf32> to vector<1x256xf32>
    %551 = vector.broadcast %547 : vector<8x1xf32> to vector<8x256xf32>
    %552 = vector.broadcast %550 : vector<1x256xf32> to vector<8x256xf32>
    %553 = arith.mulf %551, %552 : vector<8x256xf32>
    %554 = arith.addf %538, %553 : vector<8x256xf32>
    %555 = vector.extract_strided_slice %513 {offsets = [1, 2, 0], sizes = [1, 1, 256], strides = [1, 1, 1]} : vector<2x4x256xf32> to vector<1x1x256xf32>
    %556 = vector.shape_cast %555 : vector<1x1x256xf32> to vector<256xf32>
    %557 = vector.shape_cast %556 : vector<256xf32> to vector<1x256xf32>
    %558 = vector.broadcast %547 : vector<8x1xf32> to vector<8x256xf32>
    %559 = vector.broadcast %557 : vector<1x256xf32> to vector<8x256xf32>
    %560 = arith.mulf %558, %559 : vector<8x256xf32>
    %561 = arith.addf %545, %560 : vector<8x256xf32>
    %c31 = arith.constant 31 : index
    %c0_81 = arith.constant 0 : index
    %c0_82 = arith.constant 0 : index
    %562 = vector.load %arg1[%c31, %c0_81, %c0_82] : memref<36x8x1xf32, #tpu.memory_space<vmem>>, vector<1x8x1xf32>
    %563 = vector.shape_cast %562 : vector<1x8x1xf32> to vector<8x1xf32>
    %564 = vector.extract_strided_slice %513 {offsets = [0, 3, 0], sizes = [1, 1, 256], strides = [1, 1, 1]} : vector<2x4x256xf32> to vector<1x1x256xf32>
    %565 = vector.shape_cast %564 : vector<1x1x256xf32> to vector<256xf32>
    %566 = vector.shape_cast %565 : vector<256xf32> to vector<1x256xf32>
    %567 = vector.broadcast %563 : vector<8x1xf32> to vector<8x256xf32>
    %568 = vector.broadcast %566 : vector<1x256xf32> to vector<8x256xf32>
    %569 = arith.mulf %567, %568 : vector<8x256xf32>
    %570 = arith.addf %554, %569 : vector<8x256xf32>
    %571 = vector.extract_strided_slice %513 {offsets = [1, 3, 0], sizes = [1, 1, 256], strides = [1, 1, 1]} : vector<2x4x256xf32> to vector<1x1x256xf32>
    %572 = vector.shape_cast %571 : vector<1x1x256xf32> to vector<256xf32>
    %573 = vector.shape_cast %572 : vector<256xf32> to vector<1x256xf32>
    %574 = vector.broadcast %563 : vector<8x1xf32> to vector<8x256xf32>
    %575 = vector.broadcast %573 : vector<1x256xf32> to vector<8x256xf32>
    %576 = arith.mulf %574, %575 : vector<8x256xf32>
    %577 = arith.addf %561, %576 : vector<8x256xf32>
    %c239_i32 = arith.constant 239 : i32
    %578 = tpu.dynamic_rotate %0 by %c239_i32 dim 2 : vector<2x4x256xf32>, i32 -> vector<2x4x256xf32>
    %579 = arith.andi %25, %21 : vector<1x1x256xi1>
    %cst_83 = arith.constant 0.000000e+00 : f32
    %580 = vector.shape_cast %579 : vector<1x1x256xi1> to vector<1x1x256xi1>
    %581 = vector.broadcast %580 : vector<1x1x256xi1> to vector<2x4x256xi1>
    %582 = vector.broadcast %cst_83 : f32 to vector<2x4x256xf32>
    %583 = arith.select %581, %578, %582 : vector<2x4x256xi1>, vector<2x4x256xf32>
    %c32 = arith.constant 32 : index
    %c0_84 = arith.constant 0 : index
    %c0_85 = arith.constant 0 : index
    %584 = vector.load %arg1[%c32, %c0_84, %c0_85] : memref<36x8x1xf32, #tpu.memory_space<vmem>>, vector<1x8x1xf32>
    %585 = vector.shape_cast %584 : vector<1x8x1xf32> to vector<8x1xf32>
    %586 = vector.extract_strided_slice %583 {offsets = [0, 0, 0], sizes = [1, 1, 256], strides = [1, 1, 1]} : vector<2x4x256xf32> to vector<1x1x256xf32>
    %587 = vector.shape_cast %586 : vector<1x1x256xf32> to vector<256xf32>
    %588 = vector.shape_cast %587 : vector<256xf32> to vector<1x256xf32>
    %589 = vector.broadcast %585 : vector<8x1xf32> to vector<8x256xf32>
    %590 = vector.broadcast %588 : vector<1x256xf32> to vector<8x256xf32>
    %591 = arith.mulf %589, %590 : vector<8x256xf32>
    %592 = arith.addf %570, %591 : vector<8x256xf32>
    %593 = vector.extract_strided_slice %583 {offsets = [1, 0, 0], sizes = [1, 1, 256], strides = [1, 1, 1]} : vector<2x4x256xf32> to vector<1x1x256xf32>
    %594 = vector.shape_cast %593 : vector<1x1x256xf32> to vector<256xf32>
    %595 = vector.shape_cast %594 : vector<256xf32> to vector<1x256xf32>
    %596 = vector.broadcast %585 : vector<8x1xf32> to vector<8x256xf32>
    %597 = vector.broadcast %595 : vector<1x256xf32> to vector<8x256xf32>
    %598 = arith.mulf %596, %597 : vector<8x256xf32>
    %599 = arith.addf %577, %598 : vector<8x256xf32>
    %c33 = arith.constant 33 : index
    %c0_86 = arith.constant 0 : index
    %c0_87 = arith.constant 0 : index
    %600 = vector.load %arg1[%c33, %c0_86, %c0_87] : memref<36x8x1xf32, #tpu.memory_space<vmem>>, vector<1x8x1xf32>
    %601 = vector.shape_cast %600 : vector<1x8x1xf32> to vector<8x1xf32>
    %602 = vector.extract_strided_slice %583 {offsets = [0, 1, 0], sizes = [1, 1, 256], strides = [1, 1, 1]} : vector<2x4x256xf32> to vector<1x1x256xf32>
    %603 = vector.shape_cast %602 : vector<1x1x256xf32> to vector<256xf32>
    %604 = vector.shape_cast %603 : vector<256xf32> to vector<1x256xf32>
    %605 = vector.broadcast %601 : vector<8x1xf32> to vector<8x256xf32>
    %606 = vector.broadcast %604 : vector<1x256xf32> to vector<8x256xf32>
    %607 = arith.mulf %605, %606 : vector<8x256xf32>
    %608 = arith.addf %592, %607 : vector<8x256xf32>
    %609 = vector.extract_strided_slice %583 {offsets = [1, 1, 0], sizes = [1, 1, 256], strides = [1, 1, 1]} : vector<2x4x256xf32> to vector<1x1x256xf32>
    %610 = vector.shape_cast %609 : vector<1x1x256xf32> to vector<256xf32>
    %611 = vector.shape_cast %610 : vector<256xf32> to vector<1x256xf32>
    %612 = vector.broadcast %601 : vector<8x1xf32> to vector<8x256xf32>
    %613 = vector.broadcast %611 : vector<1x256xf32> to vector<8x256xf32>
    %614 = arith.mulf %612, %613 : vector<8x256xf32>
    %615 = arith.addf %599, %614 : vector<8x256xf32>
    %c34 = arith.constant 34 : index
    %c0_88 = arith.constant 0 : index
    %c0_89 = arith.constant 0 : index
    %616 = vector.load %arg1[%c34, %c0_88, %c0_89] : memref<36x8x1xf32, #tpu.memory_space<vmem>>, vector<1x8x1xf32>
    %617 = vector.shape_cast %616 : vector<1x8x1xf32> to vector<8x1xf32>
    %618 = vector.extract_strided_slice %583 {offsets = [0, 2, 0], sizes = [1, 1, 256], strides = [1, 1, 1]} : vector<2x4x256xf32> to vector<1x1x256xf32>
    %619 = vector.shape_cast %618 : vector<1x1x256xf32> to vector<256xf32>
    %620 = vector.shape_cast %619 : vector<256xf32> to vector<1x256xf32>
    %621 = vector.broadcast %617 : vector<8x1xf32> to vector<8x256xf32>
    %622 = vector.broadcast %620 : vector<1x256xf32> to vector<8x256xf32>
    %623 = arith.mulf %621, %622 : vector<8x256xf32>
    %624 = arith.addf %608, %623 : vector<8x256xf32>
    %625 = vector.extract_strided_slice %583 {offsets = [1, 2, 0], sizes = [1, 1, 256], strides = [1, 1, 1]} : vector<2x4x256xf32> to vector<1x1x256xf32>
    %626 = vector.shape_cast %625 : vector<1x1x256xf32> to vector<256xf32>
    %627 = vector.shape_cast %626 : vector<256xf32> to vector<1x256xf32>
    %628 = vector.broadcast %617 : vector<8x1xf32> to vector<8x256xf32>
    %629 = vector.broadcast %627 : vector<1x256xf32> to vector<8x256xf32>
    %630 = arith.mulf %628, %629 : vector<8x256xf32>
    %631 = arith.addf %615, %630 : vector<8x256xf32>
    %c35 = arith.constant 35 : index
    %c0_90 = arith.constant 0 : index
    %c0_91 = arith.constant 0 : index
    %632 = vector.load %arg1[%c35, %c0_90, %c0_91] : memref<36x8x1xf32, #tpu.memory_space<vmem>>, vector<1x8x1xf32>
    %633 = vector.shape_cast %632 : vector<1x8x1xf32> to vector<8x1xf32>
    %634 = vector.extract_strided_slice %583 {offsets = [0, 3, 0], sizes = [1, 1, 256], strides = [1, 1, 1]} : vector<2x4x256xf32> to vector<1x1x256xf32>
    %635 = vector.shape_cast %634 : vector<1x1x256xf32> to vector<256xf32>
    %636 = vector.shape_cast %635 : vector<256xf32> to vector<1x256xf32>
    %637 = vector.broadcast %633 : vector<8x1xf32> to vector<8x256xf32>
    %638 = vector.broadcast %636 : vector<1x256xf32> to vector<8x256xf32>
    %639 = arith.mulf %637, %638 : vector<8x256xf32>
    %640 = arith.addf %624, %639 : vector<8x256xf32>
    %641 = vector.extract_strided_slice %583 {offsets = [1, 3, 0], sizes = [1, 1, 256], strides = [1, 1, 1]} : vector<2x4x256xf32> to vector<1x1x256xf32>
    %642 = vector.shape_cast %641 : vector<1x1x256xf32> to vector<256xf32>
    %643 = vector.shape_cast %642 : vector<256xf32> to vector<1x256xf32>
    %644 = vector.broadcast %633 : vector<8x1xf32> to vector<8x256xf32>
    %645 = vector.broadcast %643 : vector<1x256xf32> to vector<8x256xf32>
    %646 = arith.mulf %644, %645 : vector<8x256xf32>
    %647 = arith.addf %631, %646 : vector<8x256xf32>
    %648 = arith.addf %640, %647 : vector<8x256xf32>
    %cst_92 = arith.constant dense<0.000000e+00> : vector<8xf32>
    %649 = vector.multi_reduction <add>, %648, %cst_92 [1] : vector<8x256xf32> to vector<8xf32>
    %650 = vector.shape_cast %649 : vector<8xf32> to vector<8x1xf32>
    %cst_93 = arith.constant 0.001953125 : f32
    %651 = vector.broadcast %cst_93 : f32 to vector<8x1xf32>
    %652 = arith.mulf %650, %651 : vector<8x1xf32>
    %cst_94 = arith.constant 0.000000e+00 : f32
    %653 = vector.broadcast %cst_94 : f32 to vector<8x1xf32>
    %654 = vector.broadcast %652 : vector<8x1xf32> to vector<8x256xf32>
    %655 = arith.subf %640, %654 : vector<8x256xf32>
    %656 = arith.mulf %655, %655 : vector<8x256xf32>
    %cst_95 = arith.constant dense<0.000000e+00> : vector<8xf32>
    %657 = vector.multi_reduction <add>, %656, %cst_95 [1] : vector<8x256xf32> to vector<8xf32>
    %658 = vector.shape_cast %657 : vector<8xf32> to vector<8x1xf32>
    %659 = arith.addf %653, %658 : vector<8x1xf32>
    %660 = vector.broadcast %652 : vector<8x1xf32> to vector<8x256xf32>
    %661 = arith.subf %647, %660 : vector<8x256xf32>
    %662 = arith.mulf %661, %661 : vector<8x256xf32>
    %cst_96 = arith.constant dense<0.000000e+00> : vector<8xf32>
    %663 = vector.multi_reduction <add>, %662, %cst_96 [1] : vector<8x256xf32> to vector<8xf32>
    %664 = vector.shape_cast %663 : vector<8xf32> to vector<8x1xf32>
    %665 = arith.addf %659, %664 : vector<8x1xf32>
    %cst_97 = arith.constant 0.001953125 : f32
    %666 = vector.broadcast %cst_97 : f32 to vector<8x1xf32>
    %667 = arith.mulf %665, %666 : vector<8x1xf32>
    %c0_98 = arith.constant 0 : index
    %c0_99 = arith.constant 0 : index
    %668 = vector.load %arg2[%c0_98, %c0_99] : memref<8x1xf32, #tpu.memory_space<vmem>>, vector<8x1xf32>
    %cst_100 = arith.constant 9.99999974E-6 : f32
    %669 = vector.broadcast %cst_100 : f32 to vector<8x1xf32>
    %670 = arith.addf %667, %669 : vector<8x1xf32>
    %671 = math.rsqrt %670 : vector<8x1xf32>
    %672 = arith.mulf %668, %671 : vector<8x1xf32>
    %c0_101 = arith.constant 0 : index
    %c0_102 = arith.constant 0 : index
    %673 = vector.load %arg3[%c0_101, %c0_102] : memref<8x1xf32, #tpu.memory_space<vmem>>, vector<8x1xf32>
    %674 = arith.mulf %652, %672 : vector<8x1xf32>
    %675 = arith.subf %673, %674 : vector<8x1xf32>
    %676 = vector.broadcast %672 : vector<8x1xf32> to vector<8x256xf32>
    %677 = arith.mulf %640, %676 : vector<8x256xf32>
    %678 = vector.broadcast %675 : vector<8x1xf32> to vector<8x256xf32>
    %679 = arith.addf %677, %678 : vector<8x256xf32>
    %cst_103 = arith.constant 0.000000e+00 : f32
    %680 = vector.broadcast %cst_103 : f32 to vector<8x256xf32>
    %681 = arith.maximumf %679, %680 : vector<8x256xf32>
    %c0_104 = arith.constant 0 : index
    %c0_105 = arith.constant 0 : index
    %c0_106 = arith.constant 0 : index
    %682 = vector.load %arg4[%c0_104, %c0_105, %c0_106] : memref<2x8x256xf32, #tpu.memory_space<vmem>>, vector<1x8x256xf32>
    %683 = vector.shape_cast %682 : vector<1x8x256xf32> to vector<8x256xf32>
    %684 = vector.shape_cast %681 : vector<8x256xf32> to vector<1x8x256xf32>
    tpu.vector_store %arg4[%c0_104, %c0_105, %c0_106], %684 {strides = array<i32>} : memref<2x8x256xf32, #tpu.memory_space<vmem>>, vector<1x8x256xf32>,
    %685 = vector.broadcast %672 : vector<8x1xf32> to vector<8x256xf32>
    %686 = arith.mulf %647, %685 : vector<8x256xf32>
    %687 = vector.broadcast %675 : vector<8x1xf32> to vector<8x256xf32>
    %688 = arith.addf %686, %687 : vector<8x256xf32>
    %cst_107 = arith.constant 0.000000e+00 : f32
    %689 = vector.broadcast %cst_107 : f32 to vector<8x256xf32>
    %690 = arith.maximumf %688, %689 : vector<8x256xf32>
    %c1_108 = arith.constant 1 : index
    %c0_109 = arith.constant 0 : index
    %c0_110 = arith.constant 0 : index
    %691 = vector.load %arg4[%c1_108, %c0_109, %c0_110] : memref<2x8x256xf32, #tpu.memory_space<vmem>>, vector<1x8x256xf32>
    %692 = vector.shape_cast %691 : vector<1x8x256xf32> to vector<8x256xf32>
    %693 = vector.shape_cast %690 : vector<8x256xf32> to vector<1x8x256xf32>
    tpu.vector_store %arg4[%c1_108, %c0_109, %c0_110], %693 {strides = array<i32>} : memref<2x8x256xf32, #tpu.memory_space<vmem>>, vector<1x8x256xf32>,
    return
  }
}

</mosaic_0001>

<bundles_post_ra>
// kernel: single_conv.1
= control target key start
LH: loop header
LB: loop body
LE: loop exit
PB: predicated region body
PF: predicated region fallthrough
CT: control target
= control target key end

     0   :  { %v1544_v0 = vmov 0   ;;  %s1545_s19 = smov 17   ;;  %s1546_s29 = smov 16   ;;  %v19_v34 = vlaneseq  ;;  %s2273_s1 = inlined_call_operand.vmem [shape: f32[36,8,1], index: 1, kind: input, shape index: {}]   ;;  %s2274_s0 = inlined_call_operand.vmem [shape: f32[2,4,256], index: 0, kind: input, shape index: {}]   ;;  %s2275_s2 = inlined_call_operand.vmem [shape: f32[8,1], index: 2, kind: input, shape index: {}]   ;;  %s2276_s3 = inlined_call_operand.vmem [shape: f32[8,1], index: 3, kind: input, shape index: {}]   ;;  %s2277_s4 = inlined_call_operand.vmem [shape: f32[2,8,256], index: 4, kind: output, shape index: {}]  }
   0x1   :  { %1538 = vset.pattern.permute.xlu0 %v1544_v0  ;;  %v83_v1 = vld [vmem:[%s2273_s1] sm:$0xff]  ;;  %1539 = vset.pattern.permute.xlu1 %v1544_v0  ;;  %v1492_v3 = vld [vmem:[%s2273_s1 + $0x8] sm:$0xff]  ;;  %v1494_v7 = vld [vmem:[%s2273_s1 + $0x18] sm:$0xff]  ;;  %s1547_s12 = smov 15   ;;  %s1548_s21 = smov 1  }
   0x2   :  { %v1584_v2 = vld [vmem:[%s2274_s0] sm:$0xff]  ;;  %86 = vperm.xlu0 %1538, %v83_v1   ;;  %v1593_v4 = vld [vmem:[%s2274_s0 + $0x8] sm:$0xff]  ;;  %v1493_v8 = vld [vmem:[%s2273_s1 + $0x10] sm:$0xff]  ;;  %s1549_s11 = smov 127   ;;  %s1550_s20 = smov 113   ;;  %v1713_v36 = vand.u32 127, %v19_v34 }
   0x3   :  { %60 = vrot.lane.b32.xlu1 %v1584_v2, %s1545_s19  ;;  %v1598_v5 = vcombine.high %v1593_v4, %v1593_v4  ;;  %v1602_v6 = vcombine.high %v1584_v2, %v1584_v2  ;;  %v1495_v9 = vld [vmem:[%s2273_s1 + $0x20] sm:$0xff]  ;;  %v1496_v10 = vld [vmem:[%s2273_s1 + $0x28] sm:$0xff]  ;;  %v1498_v11 = vld [vmem:[%s2273_s1 + $0x38] sm:$0xff]  ;;  %s1551_s28 = smov 112   ;;  %v1730_v44 = vshrl.u32 %v19_v34, 7 }
   0x4   :  { %v1497_v12 = vld [vmem:[%s2273_s1 + $0x30] sm:$0xff]  ;;  %v1499_v13 = vld [vmem:[%s2273_s1 + $0x40] sm:$0xff]  ;;  %v1500_v14 = vld [vmem:[%s2273_s1 + $0x48] sm:$0xff]  ;;  %v1723_v39 = vadd.s32 128, %v1713_v36  ;;  %v26_v41 = vand.u32 15, %v1713_v36  ;;  %vm50_vm1 = vcmp.ge.s32.totalorder %v1713_v36, 16 }
   0x5   :  { %v1502_v15 = vld [vmem:[%s2273_s1 + $0x58] sm:$0xff]  ;;  %v1501_v16 = vld [vmem:[%s2273_s1 + $0x50] sm:$0xff]  ;;  %v1503_v17 = vld [vmem:[%s2273_s1 + $0x60] sm:$0xff]  ;;  %vm68_vm2 = vcmp.lt.s32.totalorder %v1713_v36, 17  ;;  %v1756_v49 = vsub.s32 0, %v1730_v44  ;;  %v1759_v50 = vsub.s32 1, %v1730_v44 }
   0x6   :  { %117 = vperm.xlu0 %1538, %v1492_v3   ;;  %v1504_v18 = vld [vmem:[%s2273_s1 + $0x68] sm:$0xff]  ;;  %v1506_v19 = vld [vmem:[%s2273_s1 + $0x78] sm:$0xff]  ;;  %v1505_v20 = vld [vmem:[%s2273_s1 + $0x70] sm:$0xff]  ;;  %v33_v43 = vand.u32 15, %v1723_v39  ;;  %vm1734_vm0 = vcmp.ge.s32.totalorder %v26_v41, 1  ;;  %vm214_vm5 = vcmp.lt.s32.totalorder %v1713_v36, 16 }
   0x7   :  { %62 = vrot.lane.b32.xlu1 %v1593_v4, %s1545_s19  ;;  %v1508_v21 = vld [vmem:[%s2273_s1 + $0x88] sm:$0xff]  ;;  %v1507_v22 = vld [vmem:[%s2273_s1 + $0x80] sm:$0xff]  ;;  %v1510_v23 = vld [vmem:[%s2273_s1 + $0x98] sm:$0xff]  ;;  %v704_v34 = vrot.slane %v1584_v2, %v1759_v50  ;;  %vm1866_vm6 = vcmp.le.s32.totalorder %v26_v41, 14  ;;  %vm359_vm7 = vcmp.lt.s32.totalorder %v1713_v36, 15  ;;  %vm506_vm10 = vcmp.lt.s32.totalorder %v1713_v36, 1 }
   0x8   :  { %v1509_v24 = vld [vmem:[%s2273_s1 + $0x90] sm:$0xff]  ;;  %v1511_v25 = vld [vmem:[%s2273_s1 + $0xa0] sm:$0xff]  ;;  %v1512_v26 = vld [vmem:[%s2273_s1 + $0xa8] sm:$0xff]  ;;  %vm1743_vm3 = vcmp.ge.s32.totalorder %v33_v43, 1  ;;  %vm1888_vm8 = vcmp.le.s32.totalorder %v33_v43, 14  ;;  %vm855_vm11 = vcmp.lt.s32.totalorder %v1713_v36, 127 }
   0x9   :  { %v1514_v27 = vld [vmem:[%s2273_s1 + $0xb8] sm:$0xff]  ;;  %v1513_v28 = vld [vmem:[%s2273_s1 + $0xb0] sm:$0xff]  ;;  %v1515_v29 = vld [vmem:[%s2273_s1 + $0xc0] sm:$0xff]  ;;  %vm53_vm12 = vcmp.lt.s32.totalorder %v1723_v39, 240  ;;  %vm1000_vm13 = vcmp.lt.s32.totalorder %v1713_v36, 113  ;;  %vm1147_vm15 = vcmp.lt.s32.totalorder %v1713_v36, 112 }
   0xa   :  { %64 = vrot.lane.b32.xlu0 %v1602_v6, %s1545_s19  ;;  %v1516_v30 = vld [vmem:[%s2273_s1 + $0xc8] sm:$0xff]  ;;  %v1518_v31 = vld [vmem:[%s2273_s1 + $0xd8] sm:$0xff]  ;;  %v1517_v32 = vld [vmem:[%s2273_s1 + $0xd0] sm:$0xff] }
   0xb   :  { %66 = vrot.lane.b32.xlu1 %v1598_v5, %s1545_s19  ;;  %v1519_v33 = vld [vmem:[%s2273_s1 + $0xe0] sm:$0xff]  ;;  %v1520_v35 = vld [vmem:[%s2273_s1 + $0xe8] sm:$0xff]  ;;  %v1522_v37 = vld [vmem:[%s2273_s1 + $0xf8] sm:$0xff] }
   0xc   :  { %v1521_v38 = vld [vmem:[%s2273_s1 + $0xf0] sm:$0xff]  ;;  %v1523_v42 = vld [vmem:[%s2273_s1 + $0x100] sm:$0xff]  ;;  %vm1751_vm4 = vmand %vm50_vm1, %vm1734_vm0 }
   0xd   :  { %v1524_v61 = vld [vmem:[%s2273_s1 + $0x108] sm:$0xff]  ;;  %vm1940_vm9 = vmand %vm50_vm1, %vm1866_vm6 }
   0xe   :  { %148 = vperm.xlu0 %1538, %v1493_v8   ;;  %vm2129_vm14 = vmand %vm53_vm12, %vm1743_vm3 }
   0xf   :  { %179 = vperm.xlu1 %1539, %v1494_v7   ;;  %v1525_v7 = vld [vmem:[%s2273_s1 + $0x110] sm:$0xff] }
  0x12   :  { %231 = vperm.xlu0 %1538, %v1495_v9  }
  0x13   :  { %206 = vrot.lane.b32.xlu1 %v1584_v2, %s1546_s29 }
  0x16   :  { %208 = vrot.lane.b32.xlu0 %v1593_v4, %s1546_s29 }
  0x17   :  { %210 = vrot.lane.b32.xlu1 %v1602_v6, %s1546_s29 }
  0x1a   :  { %212 = vrot.lane.b32.xlu0 %v1598_v5, %s1546_s29 }
  0x1b   :  { %262 = vperm.xlu1 %1539, %v1496_v10  }
  0x1e   :  { %293 = vperm.xlu0 %1538, %v1497_v12  }
  0x1f   :  { %324 = vperm.xlu1 %1539, %v1498_v11  }
  0x22   :  { %378 = vperm.xlu0 %1538, %v1499_v13  }
  0x23   :  { %351 = vrot.lane.b32.xlu1 %v1584_v2, %s1547_s12 }
  0x26   :  { %353 = vrot.lane.b32.xlu0 %v1593_v4, %s1547_s12 }
  0x27   :  { %355 = vrot.lane.b32.xlu1 %v1602_v6, %s1547_s12 }
  0x2a   :  { %357 = vrot.lane.b32.xlu0 %v1598_v5, %s1547_s12 }
  0x2b   :  { %409 = vperm.xlu1 %1539, %v1500_v14  }
  0x2e   :  { %440 = vperm.xlu0 %1538, %v1501_v16  }
  0x2f   :  { %471 = vperm.xlu1 %1539, %v1502_v15  }
  0x32   :  { %523 = vperm.xlu0 %1538, %v1503_v17  }
  0x33   :  { %498 = vrot.lane.b32.xlu1 %v1584_v2, %s1548_s21 }
  0x36   :  { %500 = vrot.lane.b32.xlu0 %v1593_v4, %s1548_s21 }
  0x37   :  { %502 = vrot.lane.b32.xlu1 %v1602_v6, %s1548_s21 }
  0x3a   :  { %504 = vrot.lane.b32.xlu0 %v1598_v5, %s1548_s21 }
  0x3b   :  { %554 = vperm.xlu1 %1539, %v1504_v18   ;;  %v1806_v18 = vsub.s32 2, %v1730_v44 }
  0x3e   :  { %585 = vperm.xlu0 %1538, %v1505_v20  }
  0x3f   :  { %616 = vperm.xlu1 %1539, %v1506_v19  }
  0x42   :  { %647 = vperm.xlu0 %1538, %v1507_v22  }
  0x43   :  { %698 = vperm.xlu1 %1539, %v1508_v21   ;;  %v707_v21 = vsub.s32 5, %v1730_v44 }
  0x46   :  { %749 = vperm.xlu0 %1538, %v1509_v24  }
  0x47   :  { %800 = vperm.xlu1 %1539, %v1510_v23  }
  0x4a   :  { %872 = vperm.xlu0 %1538, %v1511_v25  }
  0x4b   :  { %847 = vrot.lane.b32.xlu1 %v1584_v2, %s1549_s11 }
  0x4e   :  { %849 = vrot.lane.b32.xlu0 %v1593_v4, %s1549_s11 }
  0x4f   :  { %851 = vrot.lane.b32.xlu1 %v1602_v6, %s1549_s11 }
  0x52   :  { %853 = vrot.lane.b32.xlu0 %v1598_v5, %s1549_s11  ;;  %s1552_s11 = smov 111  }
  0x53   :  { %903 = vperm.xlu1 %1539, %v1512_v26  }
  0x56   :  { %934 = vperm.xlu0 %1538, %v1513_v28  }
  0x57   :  { %965 = vperm.xlu1 %1539, %v1514_v27  }
  0x5a   :  { %1019 = vperm.xlu0 %1538, %v1515_v29  }
  0x5b   :  { %992 = vrot.lane.b32.xlu1 %v1584_v2, %s1550_s20 }
  0x5e   :  { %994 = vrot.lane.b32.xlu0 %v1593_v4, %s1550_s20 }
  0x5f   :  { %996 = vrot.lane.b32.xlu1 %v1602_v6, %s1550_s20 }
  0x62   :  { %998 = vrot.lane.b32.xlu0 %v1598_v5, %s1550_s20 }
  0x63   :  { %1050 = vperm.xlu1 %1539, %v1516_v30   ;;  %v656_v30 = vsub.s32 4, %v1730_v44 }
  0x66   :  { %1081 = vperm.xlu0 %1538, %v1517_v32  }
  0x67   :  { %1112 = vperm.xlu1 %1539, %v1518_v31   ;;  %v1813_v31 = vsub.s32 3, %v1730_v44 }
  0x6a   :  { %1164 = vperm.xlu0 %1538, %v1519_v33  }
  0x6b   :  { %1139 = vrot.lane.b32.xlu1 %v1584_v2, %s1551_s28 }
  0x6e   :  { %1141 = vrot.lane.b32.xlu0 %v1593_v4, %s1551_s28 }
  0x6f   :  { %1143 = vrot.lane.b32.xlu1 %v1602_v6, %s1551_s28 }
  0x72   :  { %1145 = vrot.lane.b32.xlu0 %v1598_v5, %s1551_s28 }
  0x73   :  { %1195 = vperm.xlu1 %1539, %v1520_v35   ;;  %v1821_v35 = vrot.slane %v1584_v2, %v707_v21 }
  0x75   :  { %v61_v40 = vpop.permute.xlu1 %60 }
  0x76   :  { %1226 = vperm.xlu0 %1538, %v1521_v38   ;;  %v1826_v38 = vrot.slane %v1593_v4, %v707_v21 }
  0x77   :  { %1257 = vperm.xlu1 %1539, %v1522_v37   ;;  %v726_v37 = vrot.slane %v1593_v4, %v1759_v50 }
  0x79   :  { %v63_v45 = vpop.permute.xlu1 %62 }
  0x7a   :  { %1311 = vperm.xlu0 %1538, %v1523_v42  }
  0x7b   :  { %1284 = vrot.lane.b32.xlu1 %v1584_v2, %s1552_s11 }
  0x7d   :  { %v67_v51 = vpop.permute.xlu1 %66  ;;  %v87_v54 = vpop.permute.xlu0 %86 }
  0x7e   :  { %v70_v52 = vsel %vm68_vm2, %v63_v45, %v67_v51  ;;  %v72_v53 = vsel %vm68_vm2, %v67_v51, %v63_v45  ;;  %1286 = vrot.lane.b32.xlu0 %v1593_v4, %s1552_s11 }
  0x7f   :  { %v1767_v55 = vsel %vm1751_vm4, %v72_v53, 0.0  ;;  %v1771_v56 = vsel %vm1743_vm3, %v70_v52, 0.0  ;;  %1288 = vrot.lane.b32.xlu1 %v1602_v6, %s1552_s11  ;;  %v1526_v6 = vld [vmem:[%s2273_s1 + $0x118] sm:$0xff]  ;;  %v653_v53 = vrot.slane %v1584_v2, %v1756_v49 }
  0x80   :  { %v104_v57 = vrot.slane %v1767_v55, %v1756_v49  ;;  %v108_v58 = vrot.slane %v1771_v56, %v1756_v49  ;;  %v135_v59 = vrot.slane %v1767_v55, %v1759_v50  ;;  %v139_v60 = vrot.slane %v1771_v56, %v1759_v50 }
  0x81   :  { %v118_v0 = vpop.permute.xlu0 %117  ;;  %v170_v42 = vrot.slane %v1771_v56, %v1806_v18 }
  0x82   :  { %v109_v62 = vmul.f32 %v104_v57, %v87_v54  ;;  %v110_v63 = vmul.f32 %v108_v58, %v87_v54  ;;  %v140_v1 = vmul.f32 %v135_v59, %v118_v0  ;;  %v141_v3 = vmul.f32 %v139_v60, %v118_v0  ;;  %1290 = vrot.lane.b32.xlu0 %v1598_v5, %s1552_s11 }
  0x83   :  { %1342 = vperm.xlu1 %1539, %v1524_v61  }
  0x84   :  { %v142_v8 = vadd.f32 %v140_v1, %v109_v62  ;;  %v143_v9 = vadd.f32 %v141_v3, %v110_v63  ;;  %v675_v62 = vrot.slane %v1593_v4, %v1756_v49  ;;  %v197_v63 = vrot.slane %v1767_v55, %v1813_v31 }
  0x85   :  { %v65_v10 = vpop.permute.xlu0 %64 }
  0x86   :  { %v69_v11 = vsel %vm68_vm2, %v61_v40, %v65_v10  ;;  %v71_v12 = vsel %vm68_vm2, %v65_v10, %v61_v40  ;;  %1373 = vperm.xlu0 %1538, %v1525_v7   ;;  %v166_v40 = vrot.slane %v1767_v55, %v1806_v18  ;;  %v201_v55 = vrot.slane %v1771_v56, %v1813_v31 }
  0x87   :  { %1404 = vperm.xlu1 %1539, %v1526_v6   ;;  %v79_v5 = vsel %vm1751_vm4, %v71_v12, 0.0  ;;  %v80_v13 = vsel %vm1743_vm3, %v69_v11, 0.0 }
  0x88   :  { %v92_v14 = vrot.slane %v79_v5, %v1756_v49  ;;  %v96_v15 = vrot.slane %v80_v13, %v1756_v49  ;;  %v123_v16 = vrot.slane %v79_v5, %v1759_v50  ;;  %v127_v17 = vrot.slane %v80_v13, %v1759_v50 }
  0x89   :  { %v149_v20 = vpop.permute.xlu0 %148  ;;  %v154_v26 = vrot.slane %v79_v5, %v1806_v18  ;;  %v158_v27 = vrot.slane %v80_v13, %v1806_v18  ;;  %v185_v45 = vrot.slane %v79_v5, %v1813_v31  ;;  %v189_v51 = vrot.slane %v80_v13, %v1813_v31 }
  0x8a   :  { %v180_v19 = vpop.permute.xlu1 %179  ;;  %v97_v22 = vmul.f32 %v92_v14, %v87_v54  ;;  %v98_v23 = vmul.f32 %v96_v15, %v87_v54  ;;  %v128_v24 = vmul.f32 %v123_v16, %v118_v0  ;;  %v129_v25 = vmul.f32 %v127_v17, %v118_v0 }
  0x8b   :  { %v159_v48 = vmul.f32 %v154_v26, %v149_v20  ;;  %v160_v52 = vmul.f32 %v158_v27, %v149_v20  ;;  %v1839_v54 = vrot.slane %v1584_v2, %v656_v30  ;;  %v171_v58 = vmul.f32 %v166_v40, %v149_v20 }
  0x8c   :  { %v130_v28 = vadd.f32 %v128_v24, %v97_v22  ;;  %v131_v29 = vadd.f32 %v129_v25, %v98_v23  ;;  %v172_v59 = vmul.f32 %v170_v42, %v149_v20  ;;  %v190_v6 = vmul.f32 %v185_v45, %v180_v19 }
  0x8d   :  { %v1815_v33 = vpop.permute.xlu0 %231  ;;  %v191_v12 = vmul.f32 %v189_v51, %v180_v19  ;;  %v202_v5 = vmul.f32 %v197_v63, %v180_v19  ;;  %v173_v14 = vadd.f32 %v171_v58, %v142_v8 }
  0x8e   :  { %v207_v32 = vpop.permute.xlu1 %206  ;;  %v161_v57 = vadd.f32 %v159_v48, %v130_v28  ;;  %v162_v0 = vadd.f32 %v160_v52, %v131_v29  ;;  %v174_v15 = vadd.f32 %v172_v59, %v143_v9  ;;  %v203_v9 = vmul.f32 %v201_v55, %v180_v19 }
  0x90   :  { %v192_v16 = vadd.f32 %v190_v6, %v161_v57  ;;  %v193_v23 = vadd.f32 %v191_v12, %v162_v0  ;;  %v205_v40 = vadd.f32 %v203_v9, %v174_v15  ;;  %v204_v57 = vadd.f32 %v202_v5, %v173_v14 }
  0x91   :  { %v209_v61 = vpop.permute.xlu0 %208 }
  0x92   :  { %v211_v60 = vpop.permute.xlu1 %210 }
  0x93   :  { %v1847_v1 = vsel %vm214_vm5, %v207_v32, %v211_v60  ;;  %v217_v3 = vsel %vm214_vm5, %v211_v60, %v207_v32  ;;  %v1898_v60 = vrot.slane %v704_v34, %v1759_v50 }
  0x94   :  { %v1853_v7 = vsel %vm50_vm1, %v217_v3, 0.0  ;;  %v241_v10 = vrot.slane %v1847_v1, %v1756_v49  ;;  %v272_v11 = vrot.slane %v1847_v1, %v1759_v50  ;;  %v303_v58 = vrot.slane %v1847_v1, %v1806_v18 }
  0x95   :  { %v237_v13 = vrot.slane %v1853_v7, %v1756_v49  ;;  %v213_v21 = vpop.permute.xlu0 %212  ;;  %v268_v24 = vrot.slane %v1853_v7, %v1759_v50  ;;  %v299_v43 = vrot.slane %v1853_v7, %v1806_v18 }
  0x96   :  { %v243_v17 = vmul.f32 %v241_v10, %v1815_v33  ;;  %v263_v20 = vpop.permute.xlu1 %262  ;;  %v1875_v8 = vsel %vm214_vm5, %v209_v61, %v213_v21  ;;  %v218_v26 = vsel %vm214_vm5, %v213_v21, %v209_v61 }
  0x97   :  { %v242_v56 = vmul.f32 %v237_v13, %v1815_v33  ;;  %v274_v25 = vmul.f32 %v272_v11, %v263_v20  ;;  %v253_v41 = vrot.slane %v1875_v8, %v1756_v49  ;;  %v225_v29 = vsel %vm50_vm1, %v218_v26, 0.0  ;;  %vm2219_vm1 = vmand %vm53_vm12, %vm1888_vm8 }
  0x98   :  { %v245_v28 = vadd.f32 %v243_v17, %v193_v23  ;;  %v284_v32 = vrot.slane %v1875_v8, %v1759_v50  ;;  %v249_v42 = vrot.slane %v225_v29, %v1756_v49  ;;  %v280_v48 = vrot.slane %v225_v29, %v1759_v50 }
  0x99   :  { %v244_v27 = vadd.f32 %v242_v56, %v192_v16  ;;  %v255_v45 = vmul.f32 %v253_v41, %v1815_v33  ;;  %v294_v52 = vpop.permute.xlu0 %293  ;;  %v273_v59 = vmul.f32 %v268_v24, %v263_v20  ;;  %v315_v0 = vrot.slane %v1875_v8, %v1806_v18 }
  0x9a   :  { %v325_v51 = vpop.permute.xlu1 %324  ;;  %v254_v61 = vmul.f32 %v249_v42, %v1815_v33  ;;  %v276_v6 = vadd.f32 %v274_v25, %v245_v28  ;;  %v286_v10 = vmul.f32 %v284_v32, %v263_v20  ;;  %v311_v11 = vrot.slane %v225_v29, %v1806_v18 }
  0x9b   :  { %v257_v63 = vadd.f32 %v255_v45, %v205_v40  ;;  %v275_v3 = vadd.f32 %v273_v59, %v244_v27  ;;  %v285_v12 = vmul.f32 %v280_v48, %v263_v20  ;;  %v304_v5 = vmul.f32 %v299_v43, %v294_v52 }
  0x9c   :  { %v256_v55 = vadd.f32 %v254_v61, %v204_v57  ;;  %v305_v13 = vmul.f32 %v303_v58, %v294_v52  ;;  %v1912_v33 = vrot.slane %v726_v37, %v1759_v50  ;;  %v1919_v17 = vrot.slane %v1593_v4, %v656_v30 }
  0x9d   :  { %v379_v14 = vpop.permute.xlu0 %378  ;;  %v288_v21 = vadd.f32 %v286_v10, %v257_v63  ;;  %v1925_v23 = vrot.slane %v653_v53, %v1756_v49  ;;  %v667_v37 = vrot.slane %v1839_v54, %v1756_v49  ;;  %v330_v56 = vrot.slane %v1853_v7, %v1813_v31 }
  0x9e   :  { %v352_v34 = vpop.permute.xlu1 %351  ;;  %v287_v20 = vadd.f32 %v285_v12, %v256_v55  ;;  %v334_v24 = vrot.slane %v1847_v1, %v1813_v31  ;;  %v342_v30 = vrot.slane %v225_v29, %v1813_v31  ;;  %v346_v9 = vrot.slane %v1875_v8, %v1813_v31 }
  0x9f   :  { %v306_v25 = vadd.f32 %v304_v5, %v275_v3  ;;  %v307_v26 = vadd.f32 %v305_v13, %v276_v6  ;;  %v316_v41 = vmul.f32 %v311_v11, %v294_v52  ;;  %v317_v7 = vmul.f32 %v315_v0, %v294_v52 }
  0xa0   :  { %v335_v1 = vmul.f32 %v330_v56, %v325_v51  ;;  %v336_v32 = vmul.f32 %v334_v24, %v325_v51  ;;  %v1964_v58 = vrot.slane %v675_v62, %v1756_v49  ;;  %v2278_v59 = vsub.s32 6, %v1730_v44 }
  0xa1   :  { %v354_v28 = vpop.permute.xlu0 %353  ;;  %v318_v40 = vadd.f32 %v316_v41, %v287_v20  ;;  %v319_v42 = vadd.f32 %v317_v7, %v288_v21  ;;  %v347_v43 = vmul.f32 %v342_v30, %v325_v51  ;;  %v348_v61 = vmul.f32 %v346_v9, %v325_v51 }
  0xa2   :  { %v356_v27 = vpop.permute.xlu1 %355  ;;  %v337_v63 = vadd.f32 %v335_v1, %v306_v25  ;;  %v338_v0 = vadd.f32 %v336_v32, %v307_v26 }
  0xa3   :  { %v360_v29 = vsel %vm359_vm7, %v352_v34, %v356_v27  ;;  %v362_v8 = vsel %vm359_vm7, %v356_v27, %v352_v34  ;;  %v349_v5 = vadd.f32 %v347_v43, %v318_v40  ;;  %v350_v13 = vadd.f32 %v348_v61, %v319_v42 }
  0xa4   :  { %v1950_v45 = vsel %vm1940_vm9, %v362_v8, 0.0  ;;  %v1954_v48 = vsel %vm1888_vm8, %v360_v29, 0.0 }
  0xa5   :  { %v384_v52 = vrot.slane %v1950_v45, %v1756_v49  ;;  %v388_v57 = vrot.slane %v1954_v48, %v1756_v49  ;;  %v358_v6 = vpop.permute.xlu0 %357  ;;  %v415_v55 = vrot.slane %v1950_v45, %v1759_v50  ;;  %v419_v12 = vrot.slane %v1954_v48, %v1759_v50 }
  0xa6   :  { %v410_v3 = vpop.permute.xlu1 %409  ;;  %v361_v62 = vsel %vm359_vm7, %v354_v28, %v358_v6  ;;  %v363_v51 = vsel %vm359_vm7, %v358_v6, %v354_v28  ;;  %v446_v7 = vrot.slane %v1950_v45, %v1806_v18  ;;  %v450_v53 = vrot.slane %v1954_v48, %v1806_v18 }
  0xa7   :  { %v389_v10 = vmul.f32 %v384_v52, %v379_v14  ;;  %v390_v11 = vmul.f32 %v388_v57, %v379_v14  ;;  %v372_v21 = vsel %vm1940_vm9, %v363_v51, 0.0  ;;  %v373_v56 = vsel %vm1888_vm8, %v361_v62, 0.0 }
  0xa8   :  { %v396_v24 = vrot.slane %v372_v21, %v1756_v49  ;;  %v400_v30 = vrot.slane %v373_v56, %v1756_v49  ;;  %v427_v9 = vrot.slane %v372_v21, %v1759_v50  ;;  %v431_v25 = vrot.slane %v373_v56, %v1759_v50 }
  0xa9   :  { %v391_v34 = vadd.f32 %v389_v10, %v337_v63  ;;  %v392_v20 = vadd.f32 %v390_v11, %v338_v0  ;;  %v441_v41 = vpop.permute.xlu0 %440  ;;  %v420_v27 = vmul.f32 %v415_v55, %v410_v3  ;;  %v421_v28 = vmul.f32 %v419_v12, %v410_v3 }
  0xaa   :  { %v472_v26 = vpop.permute.xlu1 %471  ;;  %v401_v1 = vmul.f32 %v396_v24, %v379_v14  ;;  %v402_v32 = vmul.f32 %v400_v30, %v379_v14  ;;  %v458_v29 = vrot.slane %v372_v21, %v1806_v18  ;;  %v462_v8 = vrot.slane %v373_v56, %v1806_v18 }
  0xab   :  { %v422_v40 = vadd.f32 %v420_v27, %v391_v34  ;;  %v423_v42 = vadd.f32 %v421_v28, %v392_v20  ;;  %v432_v52 = vmul.f32 %v427_v9, %v410_v3  ;;  %v433_v57 = vmul.f32 %v431_v25, %v410_v3 }
  0xac   :  { %v403_v43 = vadd.f32 %v401_v1, %v349_v5  ;;  %v404_v61 = vadd.f32 %v402_v32, %v350_v13  ;;  %v451_v63 = vmul.f32 %v446_v7, %v441_v41  ;;  %v452_v0 = vmul.f32 %v450_v53, %v441_v41 }
  0xad   :  { %v524_v10 = vpop.permute.xlu0 %523  ;;  %v489_v11 = vrot.slane %v372_v21, %v1813_v31  ;;  %v493_v55 = vrot.slane %v373_v56, %v1813_v31  ;;  %v463_v34 = vmul.f32 %v458_v29, %v441_v41  ;;  %v464_v3 = vmul.f32 %v462_v8, %v441_v41 }
  0xae   :  { %v499_v6 = vpop.permute.xlu1 %498  ;;  %v434_v62 = vadd.f32 %v432_v52, %v403_v43  ;;  %v435_v51 = vadd.f32 %v433_v57, %v404_v61  ;;  %v477_v5 = vrot.slane %v1950_v45, %v1813_v31  ;;  %v481_v13 = vrot.slane %v1954_v48, %v1813_v31 }
  0xaf   :  { %v755_v20 = vrot.slane %v1584_v2, %v1806_v18  ;;  %v2005_v21 = vrot.slane %v1584_v2, %v2278_v59  ;;  %v453_v56 = vadd.f32 %v451_v63, %v422_v40  ;;  %v454_v24 = vadd.f32 %v452_v0, %v423_v42 }
  0xb0   :  { %v465_v30 = vadd.f32 %v463_v34, %v434_v62  ;;  %v466_v9 = vadd.f32 %v464_v3, %v435_v51  ;;  %v482_v7 = vmul.f32 %v477_v5, %v472_v26  ;;  %v483_v53 = vmul.f32 %v481_v13, %v472_v26 }
  0xb1   :  { %v501_v41 = vpop.permute.xlu0 %500  ;;  %v494_v27 = vmul.f32 %v489_v11, %v472_v26  ;;  %v495_v28 = vmul.f32 %v493_v55, %v472_v26 }
  0xb2   :  { %v503_v25 = vpop.permute.xlu1 %502  ;;  %v484_v52 = vadd.f32 %v482_v7, %v453_v56  ;;  %v485_v57 = vadd.f32 %v483_v53, %v454_v24 }
  0xb3   :  { %v507_v45 = vsel %vm506_vm10, %v499_v6, %v503_v25  ;;  %v509_v48 = vsel %vm506_vm10, %v503_v25, %v499_v6  ;;  %v496_v43 = vadd.f32 %v494_v27, %v465_v30  ;;  %v497_v61 = vadd.f32 %v495_v28, %v466_v9 }
  0xb4   :  { %v515_v1 = vsel %vm1734_vm0, %v509_v48, 0.0  ;;  %v516_v32 = vsel %vm1743_vm3, %v507_v45, 0.0 }
  0xb5   :  { %v529_v29 = vrot.slane %v515_v1, %v1756_v49  ;;  %v533_v8 = vrot.slane %v516_v32, %v1756_v49  ;;  %v560_v40 = vrot.slane %v515_v1, %v1759_v50  ;;  %v564_v42 = vrot.slane %v516_v32, %v1759_v50  ;;  %v505_v26 = vpop.permute.xlu0 %504 }
  0xb6   :  { %v555_v63 = vpop.permute.xlu1 %554  ;;  %v591_v11 = vrot.slane %v515_v1, %v1806_v18  ;;  %v595_v55 = vrot.slane %v516_v32, %v1806_v18  ;;  %v508_v34 = vsel %vm506_vm10, %v501_v41, %v505_v26  ;;  %v510_v3 = vsel %vm506_vm10, %v505_v26, %v501_v41 }
  0xb7   :  { %v534_v0 = vmul.f32 %v529_v29, %v524_v10  ;;  %v535_v6 = vmul.f32 %v533_v8, %v524_v10  ;;  %v565_v62 = vmul.f32 %v560_v40, %v555_v63  ;;  %v566_v51 = vmul.f32 %v564_v42, %v555_v63 }
  0xb8   :  { %v517_v56 = vsel %vm1734_vm0, %v510_v3, 0.0  ;;  %v518_v24 = vsel %vm1743_vm3, %v508_v34, 0.0  ;;  %v622_v41 = vrot.slane %v515_v1, %v1813_v31  ;;  %v626_v48 = vrot.slane %v516_v32, %v1813_v31 }
  0xb9   :  { %v536_v5 = vadd.f32 %v534_v0, %v484_v52  ;;  %v537_v13 = vadd.f32 %v535_v6, %v485_v57  ;;  %v541_v30 = vrot.slane %v517_v56, %v1756_v49  ;;  %v545_v9 = vrot.slane %v518_v24, %v1756_v49  ;;  %v586_v45 = vpop.permute.xlu0 %585 }
  0xba   :  { %v572_v25 = vrot.slane %v517_v56, %v1759_v50  ;;  %v576_v7 = vrot.slane %v518_v24, %v1759_v50  ;;  %v617_v53 = vpop.permute.xlu1 %616  ;;  %v603_v27 = vrot.slane %v517_v56, %v1806_v18  ;;  %v607_v28 = vrot.slane %v518_v24, %v1806_v18 }
  0xbb   :  { %v567_v29 = vadd.f32 %v565_v62, %v536_v5  ;;  %v568_v8 = vadd.f32 %v566_v51, %v537_v13  ;;  %v546_v40 = vmul.f32 %v541_v30, %v524_v10  ;;  %v547_v42 = vmul.f32 %v545_v9, %v524_v10 }
  0xbc   :  { %v577_v52 = vmul.f32 %v572_v25, %v555_v63  ;;  %v578_v57 = vmul.f32 %v576_v7, %v555_v63  ;;  %v634_v26 = vrot.slane %v517_v56, %v1813_v31  ;;  %v638_v0 = vrot.slane %v518_v24, %v1813_v31 }
  0xbd   :  { %v548_v6 = vadd.f32 %v546_v40, %v496_v43  ;;  %v549_v34 = vadd.f32 %v547_v42, %v497_v61  ;;  %v596_v3 = vmul.f32 %v591_v11, %v586_v45  ;;  %v597_v1 = vmul.f32 %v595_v55, %v586_v45  ;;  %v648_v32 = vpop.permute.xlu0 %647 }
  0xbe   :  { %v699_v12 = vpop.permute.xlu1 %698  ;;  %v627_v16 = vmul.f32 %v622_v41, %v617_v53  ;;  %v628_v15 = vmul.f32 %v626_v48, %v617_v53  ;;  %v608_v14 = vmul.f32 %v603_v27, %v586_v45  ;;  %v609_v59 = vmul.f32 %v607_v28, %v586_v45 }
  0xbf   :  { %v579_v62 = vadd.f32 %v577_v52, %v548_v6  ;;  %v580_v51 = vadd.f32 %v578_v57, %v549_v34  ;;  %v598_v5 = vadd.f32 %v596_v3, %v567_v29  ;;  %v599_v10 = vadd.f32 %v597_v1, %v568_v8 }
  0xc0   :  { %v639_v13 = vmul.f32 %v634_v26, %v617_v53  ;;  %v640_v63 = vmul.f32 %v638_v0, %v617_v53  ;;  %v809_v56 = vsub.s32 7, %v1730_v44  ;;  %v828_v43 = vrot.slane %v1593_v4, %v1813_v31 }
  0xc1   :  { %v610_v61 = vadd.f32 %v608_v14, %v579_v62  ;;  %v611_v11 = vadd.f32 %v609_v59, %v580_v51  ;;  %v629_v55 = vadd.f32 %v627_v16, %v598_v5  ;;  %v630_v24 = vadd.f32 %v628_v15, %v599_v10  ;;  %v750_v9 = vpop.permute.xlu0 %749 }
  0xc2   :  { %v801_v30 = vpop.permute.xlu1 %800  ;;  %v668_v25 = vmul.f32 %v1925_v23, %v648_v32  ;;  %v669_v7 = vmul.f32 %v667_v37, %v648_v32  ;;  %v765_v53 = vrot.slane %v755_v20, %v1806_v18  ;;  %v777_v45 = vrot.slane %v1593_v4, %v1806_v18 }
  0xc3   :  { %v641_v14 = vadd.f32 %v639_v13, %v610_v61  ;;  %v642_v59 = vadd.f32 %v640_v63, %v611_v11  ;;  %v769_v15 = vrot.slane %v2005_v21, %v1806_v18  ;;  %v2291_v16 = vsub.s32 6, %v1730_v44 }
  0xc4   :  { %v670_v41 = vadd.f32 %v668_v25, %v629_v55  ;;  %v671_v54 = vadd.f32 %v669_v7, %v630_v24  ;;  %v690_v37 = vmul.f32 %v1964_v58, %v648_v32  ;;  %v2292_v48 = vrot.slane %v1919_v17, %v1756_v49 }
  0xc5   :  { %v781_v23 = vrot.slane %v1593_v4, %v2291_v16  ;;  %v719_v27 = vmul.f32 %v1898_v60, %v699_v12  ;;  %v2293_v28 = vrot.slane %v1821_v35, %v1759_v50  ;;  %v810_v21 = vrot.slane %v1584_v2, %v809_v56  ;;  %v873_v40 = vpop.permute.xlu0 %872 }
  0xc6   :  { %v691_v20 = vmul.f32 %v2292_v48, %v648_v32  ;;  %v832_v44 = vrot.slane %v1593_v4, %v809_v56  ;;  %v848_v8 = vpop.permute.xlu1 %847  ;;  %v692_v42 = vadd.f32 %v690_v37, %v641_v14  ;;  %v770_v17 = vmul.f32 %v765_v53, %v750_v9 }
  0xc7   :  { %v720_v29 = vmul.f32 %v2293_v28, %v699_v12  ;;  %v721_v58 = vadd.f32 %v719_v27, %v670_v41  ;;  %v771_v26 = vmul.f32 %v769_v15, %v750_v9  ;;  %v741_v60 = vmul.f32 %v1912_v33, %v699_v12 }
  0xc8   :  { %v693_v52 = vadd.f32 %v691_v20, %v642_v59  ;;  %v2294_v35 = vrot.slane %v1826_v38, %v1759_v50  ;;  %v787_v6 = vrot.slane %v777_v45, %v1806_v18  ;;  %v791_v4 = vrot.slane %v781_v23, %v1806_v18 }
  0xc9   :  { %v722_v57 = vadd.f32 %v720_v29, %v671_v54  ;;  %v2295_v34 = vrot.slane %v1584_v2, %v1813_v31  ;;  %v820_v1 = vrot.slane %v810_v21, %v1813_v31  ;;  %v838_v32 = vrot.slane %v828_v43, %v1813_v31  ;;  %v850_v51 = vpop.permute.xlu0 %849 }
  0xca   :  { %v742_v0 = vmul.f32 %v2294_v35, %v699_v12  ;;  %v842_v62 = vrot.slane %v832_v44, %v1813_v31  ;;  %v852_v33 = vpop.permute.xlu1 %851  ;;  %v743_v5 = vadd.f32 %v741_v60, %v692_v42  ;;  %v772_v13 = vadd.f32 %v770_v17, %v721_v58 }
  0xcb   :  { %v816_v3 = vrot.slane %v2295_v34, %v1813_v31  ;;  %v856_v12 = vsel %vm855_vm11, %v848_v8, %v852_v33  ;;  %v858_v10 = vsel %vm855_vm11, %v852_v33, %v848_v8  ;;  %v773_v63 = vadd.f32 %v771_v26, %v722_v57 }
  0xcc   :  { %v744_v38 = vadd.f32 %v742_v0, %v693_v52  ;;  %v2087_v2 = vsel %vm1866_vm6, %v856_v12, 0.0  ;;  %v2091_v56 = vsel %vm1888_vm8, %v858_v10, 0.0  ;;  %v792_v43 = vmul.f32 %v787_v6, %v750_v9 }
  0xcd   :  { %v793_v61 = vmul.f32 %v791_v4, %v750_v9  ;;  %v878_v11 = vrot.slane %v2087_v2, %v1756_v49  ;;  %v882_v55 = vrot.slane %v2091_v56, %v1756_v49  ;;  %v821_v24 = vmul.f32 %v816_v3, %v801_v30  ;;  %v854_v14 = vpop.permute.xlu0 %853 }
  0xce   :  { %v822_v25 = vmul.f32 %v820_v1, %v801_v30  ;;  %v843_v7 = vmul.f32 %v838_v32, %v801_v30  ;;  %v844_v53 = vmul.f32 %v842_v62, %v801_v30  ;;  %v904_v45 = vpop.permute.xlu1 %903  ;;  %v794_v59 = vadd.f32 %v792_v43, %v743_v5 }
  0xcf   :  { %v795_v15 = vadd.f32 %v793_v61, %v744_v38  ;;  %v883_v16 = vmul.f32 %v878_v11, %v873_v40  ;;  %v884_v23 = vmul.f32 %v882_v55, %v873_v40  ;;  %v823_v41 = vadd.f32 %v821_v24, %v772_v13 }
  0xd0   :  { %v824_v54 = vadd.f32 %v822_v25, %v773_v63  ;;  %v857_v9 = vsel %vm855_vm11, %v850_v51, %v854_v14  ;;  %v859_v37 = vsel %vm855_vm11, %v854_v14, %v850_v51  ;;  %v909_v48 = vrot.slane %v2087_v2, %v1759_v50 }
  0xd1   :  { %v913_v30 = vrot.slane %v2091_v56, %v1759_v50  ;;  %v866_v20 = vsel %vm1866_vm6, %v857_v9, 0.0  ;;  %v867_v27 = vsel %vm1888_vm8, %v859_v37, 0.0  ;;  %v935_v44 = vpop.permute.xlu0 %934  ;;  %v845_v8 = vadd.f32 %v843_v7, %v794_v59 }
  0xd2   :  { %v890_v28 = vrot.slane %v866_v20, %v1756_v49  ;;  %v894_v29 = vrot.slane %v867_v27, %v1756_v49  ;;  %v966_v21 = vpop.permute.xlu1 %965  ;;  %v846_v42 = vadd.f32 %v844_v53, %v795_v15  ;;  %v885_v52 = vadd.f32 %v883_v16, %v823_v41 }
  0xd3   :  { %v886_v58 = vadd.f32 %v884_v23, %v824_v54  ;;  %v921_v26 = vrot.slane %v866_v20, %v1759_v50  ;;  %v925_v60 = vrot.slane %v867_v27, %v1759_v50  ;;  %v940_v35 = vrot.slane %v2087_v2, %v1806_v18 }
  0xd4   :  { %v895_v57 = vmul.f32 %v890_v28, %v873_v40  ;;  %v896_v17 = vmul.f32 %v894_v29, %v873_v40  ;;  %v914_v0 = vmul.f32 %v909_v48, %v904_v45  ;;  %v915_v6 = vmul.f32 %v913_v30, %v904_v45 }
  0xd5   :  { %v944_v4 = vrot.slane %v2091_v56, %v1806_v18  ;;  %v1020_v32 = vpop.permute.xlu0 %1019  ;;  %v952_v33 = vrot.slane %v866_v20, %v1806_v18  ;;  %v945_v51 = vmul.f32 %v940_v35, %v935_v44  ;;  %v926_v5 = vmul.f32 %v921_v26, %v904_v45 }
  0xd6   :  { %v897_v34 = vadd.f32 %v895_v57, %v845_v8  ;;  %v898_v3 = vadd.f32 %v896_v17, %v846_v42  ;;  %v993_v1 = vpop.permute.xlu1 %992  ;;  %v916_v40 = vadd.f32 %v914_v0, %v885_v52  ;;  %v917_v62 = vadd.f32 %v915_v6, %v886_v58 }
  0xd7   :  { %v927_v38 = vmul.f32 %v925_v60, %v904_v45  ;;  %v956_v12 = vrot.slane %v867_v27, %v1806_v18  ;;  %v946_v10 = vmul.f32 %v944_v4, %v935_v44  ;;  %v971_v13 = vrot.slane %v2087_v2, %v1813_v31 }
  0xd8   :  { %v975_v63 = vrot.slane %v2091_v56, %v1813_v31  ;;  %v983_v61 = vrot.slane %v866_v20, %v1813_v31  ;;  %v987_v11 = vrot.slane %v867_v27, %v1813_v31  ;;  %v928_v55 = vadd.f32 %v926_v5, %v897_v34 }
  0xd9   :  { %v929_v24 = vadd.f32 %v927_v38, %v898_v3  ;;  %v995_v7 = vpop.permute.xlu0 %994  ;;  %v947_v2 = vadd.f32 %v945_v51, %v916_v40  ;;  %v957_v53 = vmul.f32 %v952_v33, %v935_v44  ;;  %v948_v45 = vadd.f32 %v946_v10, %v917_v62 }
  0xda   :  { %v997_v25 = vpop.permute.xlu1 %996  ;;  %v958_v14 = vmul.f32 %v956_v12, %v935_v44  ;;  %v976_v16 = vmul.f32 %v971_v13, %v966_v21  ;;  %v977_v54 = vmul.f32 %v975_v63, %v966_v21  ;;  %v988_v9 = vmul.f32 %v983_v61, %v966_v21 }
  0xdb   :  { %v1001_v56 = vsel %vm1000_vm13, %v993_v1, %v997_v25  ;;  %v1003_v47 = vsel %vm1000_vm13, %v997_v25, %v993_v1  ;;  %v959_v37 = vadd.f32 %v957_v53, %v928_v55  ;;  %v989_v8 = vmul.f32 %v987_v11, %v966_v21 }
  0xdc   :  { %v1011_v59 = vsel %vm1734_vm0, %v1001_v56, 0.0  ;;  %v2143_v15 = vsel %vm2129_vm14, %v1003_v47, 0.0  ;;  %v960_v48 = vadd.f32 %v958_v14, %v929_v24  ;;  %v978_v27 = vadd.f32 %v976_v16, %v947_v2 }
  0xdd   :  { %v1025_v23 = vrot.slane %v1011_v59, %v1756_v49  ;;  %v1029_v41 = vrot.slane %v2143_v15, %v1756_v49  ;;  %v999_v20 = vpop.permute.xlu0 %998  ;;  %v1056_v44 = vrot.slane %v1011_v59, %v1759_v50  ;;  %v979_v42 = vadd.f32 %v977_v54, %v948_v45 }
  0xde   :  { %v1051_v30 = vpop.permute.xlu1 %1050  ;;  %v1002_v52 = vsel %vm1000_vm13, %v995_v7, %v999_v20  ;;  %v1004_v58 = vsel %vm1000_vm13, %v999_v20, %v995_v7  ;;  %v1060_v57 = vrot.slane %v2143_v15, %v1759_v50  ;;  %v990_v34 = vadd.f32 %v988_v9, %v959_v37 }
  0xdf   :  { %v1030_v28 = vmul.f32 %v1025_v23, %v1020_v32  ;;  %v1031_v29 = vmul.f32 %v1029_v41, %v1020_v32  ;;  %v1013_v26 = vsel %vm1734_vm0, %v1002_v52, 0.0  ;;  %v1014_v60 = vsel %vm2129_vm14, %v1004_v58, 0.0 }
  0xe0   :  { %v1037_v35 = vrot.slane %v1013_v26, %v1756_v49  ;;  %v1041_v21 = vrot.slane %v1014_v60, %v1756_v49  ;;  %v1068_v0 = vrot.slane %v1013_v26, %v1759_v50  ;;  %v991_v3 = vadd.f32 %v989_v8, %v960_v48 }
  0xe1   :  { %v1032_v17 = vadd.f32 %v1030_v28, %v978_v27  ;;  %v1082_v4 = vpop.permute.xlu0 %1081  ;;  %v1033_v1 = vadd.f32 %v1031_v29, %v979_v42  ;;  %v1061_v40 = vmul.f32 %v1056_v44, %v1051_v30  ;;  %v1087_v62 = vrot.slane %v1011_v59, %v1806_v18 }
  0xe2   :  { %v1113_v6 = vpop.permute.xlu1 %1112  ;;  %v1042_v33 = vmul.f32 %v1037_v35, %v1020_v32  ;;  %v1043_v46 = vmul.f32 %v1041_v21, %v1020_v32  ;;  %v1072_v51 = vrot.slane %v1014_v60, %v1759_v50  ;;  %v1091_v5 = vrot.slane %v2143_v15, %v1806_v18 }
  0xe3   :  { %v1062_v38 = vmul.f32 %v1060_v57, %v1051_v30  ;;  %v1063_v12 = vadd.f32 %v1061_v40, %v1032_v17  ;;  %v1099_v10 = vrot.slane %v1013_v26, %v1806_v18  ;;  %v1073_v43 = vmul.f32 %v1068_v0, %v1051_v30 }
  0xe4   :  { %v1044_v13 = vadd.f32 %v1042_v33, %v990_v34  ;;  %v1045_v63 = vadd.f32 %v1043_v46, %v991_v3  ;;  %v1092_v61 = vmul.f32 %v1087_v62, %v1082_v4  ;;  %v1093_v25 = vmul.f32 %v1091_v5, %v1082_v4 }
  0xe5   :  { %v1165_v55 = vpop.permute.xlu0 %1164  ;;  %v1064_v24 = vadd.f32 %v1062_v38, %v1033_v1  ;;  %v1074_v7 = vmul.f32 %v1072_v51, %v1051_v30  ;;  %v1103_v32 = vrot.slane %v1014_v60, %v1806_v18  ;;  %v1118_v53 = vrot.slane %v1011_v59, %v1813_v31 }
  0xe6   :  { %v1140_v11 = vpop.permute.xlu1 %1139  ;;  %v1075_v2 = vadd.f32 %v1073_v43, %v1044_v13  ;;  %v1122_v56 = vrot.slane %v2143_v15, %v1813_v31  ;;  %v1130_v47 = vrot.slane %v1013_v26, %v1813_v31  ;;  %v1134_v45 = vrot.slane %v1014_v60, %v1813_v31 }
  0xe7   :  { %v1076_v14 = vadd.f32 %v1074_v7, %v1045_v63  ;;  %v1094_v16 = vadd.f32 %v1092_v61, %v1063_v12  ;;  %v1104_v23 = vmul.f32 %v1099_v10, %v1082_v4  ;;  %v1123_v9 = vmul.f32 %v1118_v53, %v1113_v6 }
  0xe8   :  { %v1095_v37 = vadd.f32 %v1093_v25, %v1064_v24  ;;  %v1105_v30 = vmul.f32 %v1103_v32, %v1082_v4  ;;  %v1124_v28 = vmul.f32 %v1122_v56, %v1113_v6  ;;  %v1135_v29 = vmul.f32 %v1130_v47, %v1113_v6 }
  0xe9   :  { %v1142_v54 = vpop.permute.xlu0 %1141  ;;  %v1106_v15 = vadd.f32 %v1104_v23, %v1075_v2  ;;  %v1136_v42 = vmul.f32 %v1134_v45, %v1113_v6  ;;  %v1125_v58 = vadd.f32 %v1123_v9, %v1094_v16  ;;  %vm1292_vm0 = vcmp.lt.s32.totalorder %v1713_v36, 111 }
  0xea   :  { %v1144_v41 = vpop.permute.xlu1 %1143  ;;  %v1107_v52 = vadd.f32 %v1105_v30, %v1076_v14  ;;  %v1126_v60 = vadd.f32 %v1124_v28, %v1095_v37 }
  0xeb   :  { %v2176_v48 = vsel %vm1147_vm15, %v1140_v11, %v1144_v41  ;;  %v1150_v59 = vsel %vm1147_vm15, %v1144_v41, %v1140_v11  ;;  %v1137_v4 = vadd.f32 %v1135_v29, %v1106_v15 }
  0xec   :  { %v2182_v20 = vsel %vm53_vm12, %v1150_v59, 0.0  ;;  %v1170_v27 = vrot.slane %v2176_v48, %v1756_v49  ;;  %v1201_v8 = vrot.slane %v2176_v48, %v1759_v50  ;;  %v1138_v46 = vadd.f32 %v1136_v42, %v1107_v52 }
  0xed   :  { %v1174_v44 = vrot.slane %v2182_v20, %v1756_v49  ;;  %v1146_v26 = vpop.permute.xlu0 %1145  ;;  %v1205_v21 = vrot.slane %v2182_v20, %v1759_v50  ;;  %v1232_v13 = vrot.slane %v2176_v48, %v1806_v18  ;;  %v1236_v63 = vrot.slane %v2182_v20, %v1806_v18 }
  0xee   :  { %v1175_v57 = vmul.f32 %v1170_v27, %v1165_v55  ;;  %v1196_v17 = vpop.permute.xlu1 %1195  ;;  %v1149_v0 = vsel %vm1147_vm15, %v1142_v54, %v1146_v26  ;;  %v1151_v34 = vsel %vm1147_vm15, %v1146_v26, %v1142_v54  ;;  %v1263_v59 = vrot.slane %v2176_v48, %v1813_v31 }
  0xef   :  { %v1176_v35 = vmul.f32 %v1174_v44, %v1165_v55  ;;  %v1182_v3 = vrot.slane %v1149_v0, %v1756_v49  ;;  %v1213_v6 = vrot.slane %v1149_v0, %v1759_v50  ;;  %v1206_v62 = vmul.f32 %v1201_v8, %v1196_v17 }
  0xf0   :  { %v1177_v1 = vadd.f32 %v1175_v57, %v1125_v58  ;;  %v1159_v33 = vsel %vm53_vm12, %v1151_v34, 0.0  ;;  %v1207_v43 = vmul.f32 %v1205_v21, %v1196_v17  ;;  %v1244_v61 = vrot.slane %v1149_v0, %v1806_v18 }
  0xf1   :  { %v1178_v40 = vadd.f32 %v1176_v35, %v1126_v60  ;;  %v1186_v51 = vrot.slane %v1159_v33, %v1756_v49  ;;  %v1187_v5 = vmul.f32 %v1182_v3, %v1165_v55  ;;  %v1217_v38 = vrot.slane %v1159_v33, %v1759_v50  ;;  %v1227_v10 = vpop.permute.xlu0 %1226 }
  0xf2   :  { %v1258_v12 = vpop.permute.xlu1 %1257  ;;  %v1218_v25 = vmul.f32 %v1213_v6, %v1196_v17  ;;  %v1248_v7 = vrot.slane %v1159_v33, %v1806_v18  ;;  %v1208_v32 = vadd.f32 %v1206_v62, %v1177_v1  ;;  %v1237_v45 = vmul.f32 %v1232_v13, %v1227_v10 }
  0xf3   :  { %v1188_v11 = vmul.f32 %v1186_v51, %v1165_v55  ;;  %v1189_v24 = vadd.f32 %v1187_v5, %v1137_v4  ;;  %v1209_v2 = vadd.f32 %v1207_v43, %v1178_v40  ;;  %v1219_v53 = vmul.f32 %v1217_v38, %v1196_v17 }
  0xf4   :  { %v1238_v14 = vmul.f32 %v1236_v63, %v1227_v10  ;;  %v1275_v41 = vrot.slane %v1149_v0, %v1813_v31  ;;  %v1279_v54 = vrot.slane %v1159_v33, %v1813_v31  ;;  %v1249_v9 = vmul.f32 %v1244_v61, %v1227_v10 }
  0xf5   :  { %v1190_v56 = vadd.f32 %v1188_v11, %v1138_v46  ;;  %v1220_v47 = vadd.f32 %v1218_v25, %v1189_v24  ;;  %v1312_v23 = vpop.permute.xlu0 %1311  ;;  %v1250_v37 = vmul.f32 %v1248_v7, %v1227_v10  ;;  %v1267_v30 = vrot.slane %v2182_v20, %v1813_v31 }
  0xf6   :  { %v1285_v16 = vpop.permute.xlu1 %1284  ;;  %v1239_v27 = vadd.f32 %v1237_v45, %v1208_v32  ;;  %v1240_v28 = vadd.f32 %v1238_v14, %v1209_v2  ;;  %v1268_v52 = vmul.f32 %v1263_v59, %v1258_v12  ;;  %v1280_v20 = vmul.f32 %v1275_v41, %v1258_v12 }
  0xf7   :  { %v1221_v55 = vadd.f32 %v1219_v53, %v1190_v56  ;;  %v1251_v29 = vadd.f32 %v1249_v9, %v1220_v47  ;;  %v1269_v58 = vmul.f32 %v1267_v30, %v1258_v12  ;;  %v1281_v39 = vmul.f32 %v1279_v54, %v1258_v12 }
  0xf8   :  { %v1270_v0 = vadd.f32 %v1268_v52, %v1239_v27 }
  0xf9   :  { %v1252_v44 = vadd.f32 %v1250_v37, %v1221_v55  ;;  %v1287_v42 = vpop.permute.xlu0 %1286  ;;  %v1271_v4 = vadd.f32 %v1269_v58, %v1240_v28  ;;  %v1282_v34 = vadd.f32 %v1280_v20, %v1251_v29 }
  0xfa   :  { %v1289_v8 = vpop.permute.xlu1 %1288 }
  0xfb   :  { %v1293_v48 = vsel %vm1292_vm0, %v1285_v16, %v1289_v8  ;;  %v1295_v19 = vsel %vm1292_vm0, %v1289_v8, %v1285_v16  ;;  %v1283_v3 = vadd.f32 %v1281_v39, %v1252_v44 }
  0xfc   :  { %v1303_v57 = vsel %vm1866_vm6, %v1293_v48, 0.0  ;;  %v1304_v17 = vsel %vm2219_vm1, %v1295_v19, 0.0 }
  0xfd   :  { %v1317_v26 = vrot.slane %v1303_v57, %v1756_v49  ;;  %v1321_v60 = vrot.slane %v1304_v17, %v1756_v49  ;;  %v1348_v35 = vrot.slane %v1303_v57, %v1759_v50  ;;  %v1352_v21 = vrot.slane %v1304_v17, %v1759_v50  ;;  %v1291_v1 = vpop.permute.xlu0 %1290 }
  0xfe   :  { %v1343_v6 = vpop.permute.xlu1 %1342  ;;  %v1379_v33 = vrot.slane %v1303_v57, %v1806_v18  ;;  %v1383_v46 = vrot.slane %v1304_v17, %v1806_v18  ;;  %v1294_v38 = vsel %vm1292_vm0, %v1287_v42, %v1291_v1  ;;  %v1296_v12 = vsel %vm1292_vm0, %v1291_v1, %v1287_v42 }
  0xff   :  { %v1322_v40 = vmul.f32 %v1317_v26, %v1312_v23  ;;  %v1323_v62 = vmul.f32 %v1321_v60, %v1312_v23  ;;  %v1353_v51 = vmul.f32 %v1348_v35, %v1343_v6  ;;  %v1354_v5 = vmul.f32 %v1352_v21, %v1343_v6 }
 0x100   :  { %v1305_v63 = vsel %vm1866_vm6, %v1294_v38, 0.0  ;;  %v1306_v43 = vsel %vm2219_vm1, %v1296_v12, 0.0  ;;  %v1410_v22 = vrot.slane %v1303_v57, %v1813_v31  ;;  %v1414_v56 = vrot.slane %v1304_v17, %v1813_v31  ;;  %v1454_v38 = vld [vmem:[%s2275_s2] sm:$0xff] }
 0x101   :  { %v1324_v10 = vadd.f32 %v1322_v40, %v1270_v0  ;;  %v1325_v13 = vadd.f32 %v1323_v62, %v1271_v4  ;;  %v1329_v61 = vrot.slane %v1305_v63, %v1756_v49  ;;  %v1333_v11 = vrot.slane %v1306_v43, %v1756_v49  ;;  %v1374_v53 = vpop.permute.xlu0 %1373 }
 0x102   :  { %v1360_v24 = vrot.slane %v1305_v63, %v1759_v50  ;;  %v1364_v25 = vrot.slane %v1306_v43, %v1759_v50  ;;  %v1391_v36 = vrot.slane %v1305_v63, %v1806_v18  ;;  %v1395_v2 = vrot.slane %v1306_v43, %v1806_v18  ;;  %v1405_v14 = vpop.permute.xlu1 %1404 }
 0x103   :  { %v1355_v7 = vadd.f32 %v1353_v51, %v1324_v10  ;;  %v1356_v32 = vadd.f32 %v1354_v5, %v1325_v13  ;;  %v1334_v47 = vmul.f32 %v1329_v61, %v1312_v23  ;;  %v1335_v45 = vmul.f32 %v1333_v11, %v1312_v23  ;;  %v1458_v13 = vld [vmem:[%s2276_s3] sm:$0xff] }
 0x104   :  { %v1365_v16 = vmul.f32 %v1360_v24, %v1343_v6  ;;  %v1366_v49 = vmul.f32 %v1364_v25, %v1343_v6  ;;  %v1422_v41 = vrot.slane %v1305_v63, %v1813_v31  ;;  %v1426_v50 = vrot.slane %v1306_v43, %v1813_v31 }
 0x105   :  { %v1336_v54 = vadd.f32 %v1334_v47, %v1282_v34  ;;  %v1337_v55 = vadd.f32 %v1335_v45, %v1283_v3  ;;  %v1384_v9 = vmul.f32 %v1379_v33, %v1374_v53  ;;  %v1385_v37 = vmul.f32 %v1383_v46, %v1374_v53 }
 0x106   :  { %v1415_v59 = vmul.f32 %v1410_v22, %v1405_v14  ;;  %v1416_v18 = vmul.f32 %v1414_v56, %v1405_v14  ;;  %v1396_v30 = vmul.f32 %v1391_v36, %v1374_v53  ;;  %v1397_v15 = vmul.f32 %v1395_v2, %v1374_v53 }
 0x107   :  { %v1367_v27 = vadd.f32 %v1365_v16, %v1336_v54  ;;  %v1368_v28 = vadd.f32 %v1366_v49, %v1337_v55  ;;  %v1386_v29 = vadd.f32 %v1384_v9, %v1355_v7  ;;  %v1387_v44 = vadd.f32 %v1385_v37, %v1356_v32 }
 0x108   :  { %v1427_v23 = vmul.f32 %v1422_v41, %v1405_v14  ;;  %v1428_v8 = vmul.f32 %v1426_v50, %v1405_v14 }
 0x109   :  { %v1398_v42 = vadd.f32 %v1396_v30, %v1367_v27  ;;  %v1399_v52 = vadd.f32 %v1397_v15, %v1368_v28  ;;  %v1417_v58 = vadd.f32 %v1415_v59, %v1386_v29  ;;  %v1418_v48 = vadd.f32 %v1416_v18, %v1387_v44 }
 0x10b   :  { %v1429_v19 = vadd.f32 %v1427_v23, %v1398_v42  ;;  %v1430_v31 = vadd.f32 %v1428_v8, %v1399_v52 }
 0x10d   :  { %v1431_v20 = vadd.f32 %v1429_v19, %v1417_v58  ;;  %v1432_v39 = vadd.f32 %v1430_v31, %v1418_v48 }
 0x10f   :  { %v1433_v57 = vadd.f32 %v1432_v39, %v1431_v20 }
 0x111   :  { %1434 = vadd.xlane.f32.xlu0 %v1433_v57 }
 0x19a   :  { %v1435_v17 = vpop.xlane.xlu0 %1434 }
 0x19b   :  { %v1436_v26 = vmul.f32 0.001953125, %v1435_v17 }
 0x19d   :  { %v1445_v60 = vsub.f32 %v1429_v19, %v1436_v26  ;;  %v1446_v35 = vsub.f32 %v1430_v31, %v1436_v26  ;;  %v1437_v21 = vsub.f32 %v1417_v58, %v1436_v26  ;;  %v1438_v0 = vsub.f32 %v1418_v48, %v1436_v26 }
 0x19f   :  { %v1447_v4 = vmul.f32 %v1445_v60, %v1445_v60  ;;  %v1448_v34 = vmul.f32 %v1446_v35, %v1446_v35  ;;  %v1439_v3 = vmul.f32 %v1437_v21, %v1437_v21  ;;  %v1440_v6 = vmul.f32 %v1438_v0, %v1438_v0 }
 0x1a1   :  { %v1449_v1 = vadd.f32 %v1448_v34, %v1447_v4  ;;  %v1441_v40 = vadd.f32 %v1440_v6, %v1439_v3 }
 0x1a3   :  { %1450 = vadd.xlane.f32.xlu0 %v1449_v1  ;;  %1442 = vadd.xlane.f32.xlu1 %v1441_v40 }
 0x22c   :  { %v1451_v62 = vpop.xlane.xlu0 %1450  ;;  %v1443_v33 = vpop.xlane.xlu1 %1442 }
 0x22d   :  { %v1452_v46 = vadd.f32 %v1451_v62, %v1443_v33 }
 0x22f   :  { %v1453_v51 = vmul.f32 0.001953125, %v1452_v46 }
 0x231   :  { %v1455_v5 = vadd.f32 1e-05, %v1453_v51 }
 0x233   :  { %1542 = vrsqrt.f32 %v1455_v5 }
 0x240   :  { %v1543_v12 = vpop.eup %1542 }
 0x241   :  { %v1457_v10 = vmul.f32 %v1543_v12, %v1454_v38 }
 0x243   :  { %1463 = vperm.xlu0 %1538, %v1457_v10   ;;  %v1459_v63 = vmul.f32 %v1457_v10, %v1436_v26 }
 0x245   :  { %v1460_v43 = vsub.f32 %v1458_v13, %v1459_v63 }
 0x247   :  { %1470 = vperm.xlu1 %1539, %v1460_v43  }
 0x2be   :  { %v1464_v61 = vpop.permute.xlu0 %1463 }
 0x2bf   :  { %v1466_v11 = vmul.f32 %v1464_v61, %v1417_v58  ;;  %v1467_v24 = vmul.f32 %v1464_v61, %v1418_v48  ;;  %v1479_v25 = vmul.f32 %v1464_v61, %v1429_v19  ;;  %v1480_v7 = vmul.f32 %v1464_v61, %v1430_v31 }
 0x2c2   :  { %v1471_v32 = vpop.permute.xlu1 %1470 }
 0x2c3   :  { %v1473_v36 = vadd.f32 %v1471_v32, %v1466_v11  ;;  %v1474_v2 = vadd.f32 %v1471_v32, %v1467_v24  ;;  %v1481_v53 = vadd.f32 %v1479_v25, %v1471_v32  ;;  %v1482_v22 = vadd.f32 %v1480_v7, %v1471_v32 }
 0x2c5   :  { %v1475_v56 = vmax.f32 %v1473_v36, 0.0  ;;  %v1476_v47 = vmax.f32 %v1474_v2, 0.0  ;;  %v1483_v45 = vmax.f32 %v1481_v53, 0.0  ;;  %v1484_v14 = vmax.f32 %v1482_v22, 0.0 }
 0x2c7   :  { %1477 = vst [vmem:[%s2277_s4] sm:$0xff] %v1475_v56  ;;  %1478 = vst [vmem:[%s2277_s4 + $0x8] sm:$0xff] %v1476_v47 }
 0x2c8   :  { %1527 = vst [vmem:[%s2277_s4 + $0x10] sm:$0xff] %v1483_v45  ;;  %1528 = vst [vmem:[%s2277_s4 + $0x18] sm:$0xff] %v1484_v14 }

</bundles_post_ra>
